<compile_context>
chip_gen: v7x
topology: tpu7x:2x2x1
jax: 0.10.0
libtpu: 0.0.40
codegen_flags: <defaults>
</compile_context>

<pallas_src>
import math

import jax
import jax.numpy as jnp
from jax import lax
from jax.experimental import pallas as pl
from jax.experimental.pallas import tpu as pltpu


_MASK_NEG = -0.5 * float(jnp.finfo(jnp.float32).max)
_VMEM_LIMIT = 32 * 1024 * 1024  # safe on v5e/v6e (128 MiB) and v7x (64 MiB)


# ---------------------------------------------------------------------------
# 1) Tiled matmul kernel (wqkv and wo projections), bf16 operands, f32 acc
# ---------------------------------------------------------------------------
def _matmul_kernel(a_ref, b_ref, o_ref, acc_ref):
    @pl.when(pl.program_id(2) == 0)
    def _():
        acc_ref[...] = jnp.zeros_like(acc_ref)

    acc_ref[...] += jnp.dot(a_ref[...], b_ref[...],
                            preferred_element_type=jnp.float32)

    @pl.when(pl.program_id(2) == pl.num_programs(2) - 1)
    def _():
        o_ref[...] = acc_ref[...].astype(o_ref.dtype)


def pallas_matmul(a, b, *, tm=256, tn=512, tk=512):
    M, K = a.shape
    K2, N = b.shape
    assert K == K2
    tm, tn, tk = min(tm, M), min(tn, N), min(tk, K)
    assert M % tm == 0 and N % tn == 0 and K % tk == 0, (M, N, K, tm, tn, tk)
    return pl.pallas_call(
        _matmul_kernel,
        out_shape=jax.ShapeDtypeStruct((M, N), a.dtype),
        grid_spec=pltpu.PrefetchScalarGridSpec(
            num_scalar_prefetch=0,
            grid=(M // tm, N // tn, K // tk),
            in_specs=[
                pl.BlockSpec((tm, tk), lambda i, j, k: (i, k)),
                pl.BlockSpec((tk, tn), lambda i, j, k: (k, j)),
            ],
            out_specs=pl.BlockSpec((tm, tn), lambda i, j, k: (i, j)),
            scratch_shapes=[pltpu.VMEM((tm, tn), jnp.float32)],
        ),
        compiler_params=pltpu.CompilerParams(
            dimension_semantics=("parallel", "parallel", "arbitrary"),
            vmem_limit_bytes=_VMEM_LIMIT,
        ),
    )(a, b)


# ---------------------------------------------------------------------------
# 2) Fused RoPE over the packed q+k columns of the QKV projection output
#    (cos/sin generated in-kernel once per seq tile, shared by all heads)
# ---------------------------------------------------------------------------
def _make_rope_kernel(half, head_dim, n_qk_heads, attention_scaling, out_dtype):
    scale = float(attention_scaling)
    apply_scale = scale != 1.0  # trace-time branch (skip the mul when 1.0)
    D = head_dim

    def kernel(pos_ref, inv_ref, x_ref, o_ref):
        # pos_ref: (TS, 1) f32 ; inv_ref: (1, D) f32 = concat(inv_freq, inv_freq)
        # x_ref / o_ref: (TS, n_qk_heads * D) packed q|k columns.
        pos = pos_ref[...]                               # (TS, 1)
        ang = pos * inv_ref[...]                         # (TS, D) VPU broadcast
        cos_d = jnp.cos(ang)
        sin_d = jnp.sin(ang)
        if apply_scale:
            cos_d = cos_d * scale
            sin_d = sin_d * scale
        col = lax.broadcasted_iota(jnp.int32, (1, D), 1)
        sin_signed = jnp.where(col < half, -sin_d, sin_d)  # -sin | +sin halves
        cos_d = cos_d.astype(out_dtype)
        sin_signed = sin_signed.astype(out_dtype)

        # q_embed = x*cos + rotate_half(x)*sin  ==  x*cos + half_swap(x)*sin_signed
        for h in range(n_qk_heads):                      # unrolled, lane-dense
            xh = x_ref[:, h * D:(h + 1) * D]             # aligned 128-multiple slice
            swapped = pltpu.roll(xh, shift=half, axis=1)  # D = 2*half -> half-swap
            o_ref[:, h * D:(h + 1) * D] = (
                xh * cos_d + swapped * sin_signed).astype(o_ref.dtype)

    return kernel


def rope_rotate_packed(qkv, positions, inv_freq, attention_scaling=1.0, *,
                       head_dim, qk_width, seq_tile=256):
    """Rotate the packed q|k columns of qkv (B, S, total); returns (B, S, qk_width)."""
    B, S, total = qkv.shape
    D = head_dim
    half = D // 2
    assert D % 128 == 0, "packed RoPE path requires head_dim % 128 == 0"
    assert qk_width % D == 0 and qk_width <= total
    n_qk_heads = qk_width // D
    ts = min(seq_tile, S)
    assert S % ts == 0, (S, ts)

    # TODO(synk): positions streamed as a (S,1) f32 VMEM block (lane-padded);
    # could move to SMEM / iota when positions are known contiguous.
    pos2d = positions.astype(jnp.float32).reshape(S, 1)
    inv_d = jnp.concatenate([inv_freq.astype(jnp.float32).reshape(1, half)] * 2,
                            axis=-1)                     # (1, D)

    kernel = _make_rope_kernel(half, D, n_qk_heads, attention_scaling, qkv.dtype)
    qk_spec = pl.BlockSpec((None, ts, qk_width), lambda b, s: (b, s, 0))
    return pl.pallas_call(
        kernel,
        out_shape=jax.ShapeDtypeStruct((B, S, qk_width), qkv.dtype),
        grid_spec=pltpu.PrefetchScalarGridSpec(
            num_scalar_prefetch=0,
            grid=(B, S // ts),
            in_specs=[
                pl.BlockSpec((ts, 1), lambda b, s: (s, 0)),
                pl.BlockSpec((1, D), lambda b, s: (0, 0)),
                qk_spec,
            ],
            out_specs=qk_spec,
        ),
        compiler_params=pltpu.CompilerParams(
            dimension_semantics=("parallel", "parallel"),
            vmem_limit_bytes=_VMEM_LIMIT,
        ),
    )(pos2d, inv_d, qkv)


# ---------------------------------------------------------------------------
# 3) Flash attention on the packed layout: in-kernel causal mask, GQA via
#    the K/V index_map, causal KV-tile skipping
# ---------------------------------------------------------------------------
def _make_flash_kernel(scale, tq, tk, causal):
    def kernel(q_ref, k_ref, v_ref, o_ref, m_sc, l_sc, acc_sc):
        qi = pl.program_id(2)
        ki = pl.program_id(3)

        @pl.when(ki == 0)
        def _():
            m_sc[...] = jnp.full(m_sc.shape, _MASK_NEG, m_sc.dtype)
            l_sc[...] = jnp.zeros(l_sc.shape, l_sc.dtype)
            acc_sc[...] = jnp.zeros(acc_sc.shape, acc_sc.dtype)

        def tile_body():
            # (tq, D) x (tk, D) contracting D -> (tq, tk); no explicit k.T
            s = lax.dot_general(q_ref[...], k_ref[...],
                                (((1,), (1,)), ((), ())),
                                preferred_element_type=jnp.float32) * scale
            if causal:
                row = qi * tq + lax.broadcasted_iota(jnp.int32, (tq, tk), 0)
                col = ki * tk + lax.broadcasted_iota(jnp.int32, (tq, tk), 1)
                s = jnp.where(col <= row, s, _MASK_NEG)
            m_prev = m_sc[...]
            m_new = jnp.maximum(m_prev, s.max(axis=-1, keepdims=True))
            alpha = jnp.exp(m_prev - m_new)
            p = jnp.exp(s - m_new)
            l_sc[...] = alpha * l_sc[...] + p.sum(axis=-1, keepdims=True)
            acc_sc[...] = alpha * acc_sc[...] + lax.dot_general(
                p.astype(v_ref.dtype), v_ref[...], (((1,), (0,)), ((), ())),
                preferred_element_type=jnp.float32)
            m_sc[...] = m_new

        if causal:
            # Skip KV tiles that lie entirely above the causal diagonal.
            @pl.when(ki * tk <= qi * tq + (tq - 1))
            def _():
                tile_body()
        else:
            tile_body()

        @pl.when(ki == pl.num_programs(3) - 1)
        def _():
            o_ref[...] = (acc_sc[...] *
                          pl.reciprocal(l_sc[...], approx=True)).astype(o_ref.dtype)

    return kernel


def flash_attention_packed(qk_rot, qkv, *, n_head, n_kv_heads, head_dim, scale,
                           causal=True, q_tile=256, kv_tile=512):
    """qk_rot: (B, S, (H+Hkv)*D) rotated q|k; qkv: (B, S, (H+2*Hkv)*D) raw (for v)."""
    B, S, qk_width = qk_rot.shape
    H, Hkv, D = n_head, n_kv_heads, head_dim
    assert qk_width == (H + Hkv) * D
    assert H % Hkv == 0
    assert D % 128 == 0, "packed flash layout requires head_dim % 128 == 0"
    group = H // Hkv
    tq = min(q_tile, S)
    tk = min(kv_tile, S)
    assert S % tq == 0 and S % tk == 0, (S, tq, tk)

    # GQA: kv head for query head h is h // group (repeat_interleave semantics).
    q_spec = pl.BlockSpec((None, tq, D), lambda b, h, qi, ki: (b, qi, h))
    k_spec = pl.BlockSpec((None, tk, D),
                          lambda b, h, qi, ki: (b, ki, H + h // group))
    v_spec = pl.BlockSpec((None, tk, D),
                          lambda b, h, qi, ki: (b, ki, H + Hkv + h // group))
    o_spec = pl.BlockSpec((None, tq, D), lambda b, h, qi, ki: (b, qi, h))

    # TODO(synk): stacking the `group` query heads against a resident K/V tile
    # (to cut K/V HBM re-streaming by `group`) is not implemented.
    return pl.pallas_call(
        _make_flash_kernel(float(scale), tq, tk, causal),
        out_shape=jax.ShapeDtypeStruct((B, S, H * D), qk_rot.dtype),
        grid_spec=pltpu.PrefetchScalarGridSpec(
            num_scalar_prefetch=0,
            grid=(B, H, S // tq, S // tk),
            in_specs=[q_spec, k_spec, v_spec],
            out_specs=o_spec,
            scratch_shapes=[
                pltpu.VMEM((tq, 1), jnp.float32),
                pltpu.VMEM((tq, 1), jnp.float32),
                pltpu.VMEM((tq, D), jnp.float32),
            ],
        ),
        compiler_params=pltpu.CompilerParams(
            dimension_semantics=("parallel", "parallel", "parallel", "arbitrary"),
            vmem_limit_bytes=_VMEM_LIMIT,
        ),
    )(qk_rot, qk_rot, qkv)


# ---------------------------------------------------------------------------
# Attention module (parameters + forward)
# ---------------------------------------------------------------------------
def make_attention_params(key, dim, n_head, n_local_heads, head_dim, rope_base,
                          dtype=jnp.bfloat16):
    total_head_dim = (n_head + 2 * n_local_heads) * head_dim
    k1, k2 = jax.random.split(key)
    # Weights stored pre-transposed ((in, out) layout): no .T per forward pass.
    wqkv_t = (jax.random.normal(k1, (dim, total_head_dim), jnp.float32)
              / math.sqrt(dim)).astype(dtype)
    wo_t = (jax.random.normal(k2, (n_head * head_dim, dim), jnp.float32)
            / math.sqrt(dim)).astype(dtype)
    # LlamaRotaryEmbedding default rope init: attention_scaling = 1.0
    inv_freq = 1.0 / (rope_base ** (jnp.arange(0, head_dim, 2, dtype=jnp.float32)
                                    / head_dim))
    return dict(wqkv_t=wqkv_t, wo_t=wo_t, inv_freq=inv_freq, attention_scaling=1.0)


def attention_forward(params, x, mask, input_pos, *, n_head, n_local_heads,
                      head_dim, causal=True):
    # TODO(synk): kv_cache.update() (None in this config), dynamic-rope frequency
    # updates and arbitrary (non-causal) attn_mask streaming are not implemented;
    # `mask` is assumed to be the standard causal mask (generated in-kernel).
    del mask
    B, S, dim = x.shape
    H, Hkv, D = n_head, n_local_heads, head_dim
    q_size, kv_size = H * D, Hkv * D
    qk_width = q_size + kv_size
    total = q_size + 2 * kv_size

    qkv = pallas_matmul(x.reshape(B * S, dim), params["wqkv_t"])
    qkv = qkv.reshape(B, S, total)

    qk_rot = rope_rotate_packed(qkv, input_pos, params["inv_freq"],
                                params["attention_scaling"],
                                head_dim=D, qk_width=qk_width)

    y = flash_attention_packed(qk_rot, qkv, n_head=H, n_kv_heads=Hkv,
                               head_dim=D, scale=1.0 / math.sqrt(D),
                               causal=causal)
    out = pallas_matmul(y.reshape(B * S, q_size), params["wo_t"])
    return out.reshape(B, S, dim)


# ---------------------------------------------------------------------------
# Pure-JAX reference mirroring the torch forward
# ---------------------------------------------------------------------------
def _rotate_half(x):
    half = x.shape[-1] // 2
    return jnp.concatenate([-x[..., half:], x[..., :half]], axis=-1)


def _reference_forward(params, x, mask, input_pos, *, n_head, n_local_heads,
                       head_dim):
    B, S, dim = x.shape
    hp = lax.Precision.HIGHEST
    f32 = jnp.float32
    q_size = n_head * head_dim
    kv_size = n_local_heads * head_dim

    qkv = jnp.einsum("bsd,dn->bsn", x.astype(f32), params["wqkv_t"].astype(f32),
                     precision=hp).astype(x.dtype)
    q = qkv[..., :q_size]
    k = qkv[..., q_size:q_size + kv_size]
    v = qkv[..., q_size + kv_size:]
    q = q.reshape(B, S, n_head, head_dim).transpose(0, 2, 1, 3)
    k = k.reshape(B, S, n_local_heads, head_dim).transpose(0, 2, 1, 3)
    v = v.reshape(B, S, n_local_heads, head_dim).transpose(0, 2, 1, 3)

    # LlamaRotaryEmbedding.forward
    pos = input_pos.astype(f32)
    freqs = pos[:, None] * params["inv_freq"][None, :]
    emb = jnp.concatenate([freqs, freqs], axis=-1)
    cos = (jnp.cos(emb) * params["attention_scaling"]).astype(x.dtype)[None, None]
    sin = (jnp.sin(emb) * params["attention_scaling"]).astype(x.dtype)[None, None]
    q = q * cos + _rotate_half(q) * sin
    k = k * cos + _rotate_half(k) * sin

    rep = n_head // n_local_heads
    k = jnp.repeat(k, rep, axis=1)
    v = jnp.repeat(v, rep, axis=1)

    s = jnp.einsum("bhqd,bhkd->bhqk", q.astype(f32), k.astype(f32),
                   precision=hp) / math.sqrt(head_dim)
    s = jnp.where(mask, s, _MASK_NEG)
    p = jax.nn.softmax(s, axis=-1)
    y = jnp.einsum("bhqk,bhkd->bhqd", p, v.astype(f32), precision=hp)
    y = y.astype(x.dtype).transpose(0, 2, 1, 3).reshape(B, S, q_size)
    out = jnp.einsum("bsd,dn->bsn", y.astype(f32), params["wo_t"].astype(f32),
                     precision=hp)
    return out.astype(x.dtype)


if __name__ == "__main__":
    # Small Llama-like GQA config (all spec configs have head_dim = 128).
    B, S = 2, 256
    dim, n_head, n_local_heads = 512, 4, 2
    head_dim = dim // n_head          # 128
    rope_base = 500000.0

    key = jax.random.PRNGKey(0)
    kp, kx = jax.random.split(key)
    params = make_attention_params(kp, dim, n_head, n_local_heads, head_dim,
                                   rope_base)
    x = jax.random.normal(kx, (B, S, dim), dtype=jnp.float32).astype(jnp.bfloat16)
    input_pos = jnp.arange(S, dtype=jnp.int32)
    mask = (jnp.arange(S)[None, :] <= jnp.arange(S)[:, None])[None, None]  # causal

    out = attention_forward(params, x, mask, input_pos, n_head=n_head,
                            n_local_heads=n_local_heads, head_dim=head_dim)
    out = jax.block_until_ready(out)

    ref = _reference_forward(params, x, mask, input_pos, n_head=n_head,
                             n_local_heads=n_local_heads, head_dim=head_dim)
    assert out.shape == (B, S, dim) and out.dtype == x.dtype
    max_err = float(jnp.max(jnp.abs(out.astype(jnp.float32) -
                                    ref.astype(jnp.float32))))
    ref_scale = float(jnp.max(jnp.abs(ref.astype(jnp.float32))))
    assert max_err <= 2.5e-2 * ref_scale + 2.5e-2, (max_err, ref_scale)

    print("KERNEL_OK")
</pallas_src>

<mosaic_0001>
module attributes {stable_mosaic.version = 11 : i64} {
  func.func @_matmul_kernel(%arg0: i32, %arg1: i32, %arg2: i32, %arg3: memref<256x512xbf16, #tpu.memory_space<vmem>>, %arg4: memref<512x512xbf16, #tpu.memory_space<vmem>>, %arg5: memref<256x512xbf16, #tpu.memory_space<vmem>>, %arg6: memref<256x512xf32, #tpu.memory_space<vmem>>) attributes {dimension_semantics = [#tpu.dimension_semantics<parallel>, #tpu.dimension_semantics<parallel>, #tpu.dimension_semantics<arbitrary>], iteration_bounds = array<i64: 2, 2, 1>, scalar_prefetch = 0 : i64, scratch_operands = 1 : i64, tpu.core_type = #tpu.core_type<tc>, window_params = [{transform_indices = @transform_0, window_bounds = array<i64: 256, 512>}, {transform_indices = @transform_1, window_bounds = array<i64: 512, 512>}, {transform_indices = @transform_2, window_bounds = array<i64: 256, 512>}]} {
    %c0_i32 = arith.constant 0 : i32
    %0 = arith.cmpi eq, %arg2, %c0_i32 : i32
    %1 = arith.extui %0 : i1 to i32
    %c0_i32_0 = arith.constant 0 : i32
    %2 = arith.cmpi ne, %1, %c0_i32_0 : i32
    scf.if %2 {
      %cst_10 = arith.constant 0.000000e+00 : f32
      %12 = vector.broadcast %cst_10 : f32 to vector<256x512xf32>
      %c0_11 = arith.constant 0 : index
      %c0_12 = arith.constant 0 : index
      %13 = vector.load %arg6[%c0_11, %c0_12] : memref<256x512xf32, #tpu.memory_space<vmem>>, vector<256x512xf32>
      tpu.vector_store %arg6[%c0_11, %c0_12], %12 {strides = array<i32>} : memref<256x512xf32, #tpu.memory_space<vmem>>, vector<256x512xf32>,
    } else {
    }
    %c0 = arith.constant 0 : index
    %c0_1 = arith.constant 0 : index
    %3 = vector.load %arg6[%c0, %c0_1] : memref<256x512xf32, #tpu.memory_space<vmem>>, vector<256x512xf32>
    %c0_2 = arith.constant 0 : index
    %c0_3 = arith.constant 0 : index
    %4 = vector.load %arg3[%c0_2, %c0_3] : memref<256x512xbf16, #tpu.memory_space<vmem>>, vector<256x512xbf16>
    %c0_4 = arith.constant 0 : index
    %c0_5 = arith.constant 0 : index
    %5 = vector.load %arg4[%c0_4, %c0_5] : memref<512x512xbf16, #tpu.memory_space<vmem>>, vector<512x512xbf16>
    %cst = arith.constant dense<0.000000e+00> : vector<256x512xf32>
    %6 = tpu.matmul %4, %5, %cst {dimension_numbers = #tpu.dot_dimension_numbers<[1], [0], [0], [1], [0, 0, 1, 1], [], []>} : vector<256x512xbf16>, vector<512x512xbf16>, vector<256x512xf32> -> vector<256x512xf32>
    %7 = arith.addf %3, %6 : vector<256x512xf32>
    %c0_6 = arith.constant 0 : index
    %c0_7 = arith.constant 0 : index
    %8 = vector.load %arg6[%c0_6, %c0_7] : memref<256x512xf32, #tpu.memory_space<vmem>>, vector<256x512xf32>
    tpu.vector_store %arg6[%c0_6, %c0_7], %7 {strides = array<i32>} : memref<256x512xf32, #tpu.memory_space<vmem>>, vector<256x512xf32>,
    %c0_i32_8 = arith.constant 0 : i32
    %9 = arith.cmpi eq, %arg2, %c0_i32_8 : i32
    %10 = arith.extui %9 : i1 to i32
    %c0_i32_9 = arith.constant 0 : i32
    %11 = arith.cmpi ne, %10, %c0_i32_9 : i32
    scf.if %11 {
      %c0_10 = arith.constant 0 : index
      %c0_11 = arith.constant 0 : index
      %12 = vector.load %arg6[%c0_10, %c0_11] : memref<256x512xf32, #tpu.memory_space<vmem>>, vector<256x512xf32>
      %13 = arith.truncf %12 : vector<256x512xf32> to vector<256x512xbf16>
      %c0_12 = arith.constant 0 : index
      %c0_13 = arith.constant 0 : index
      %14 = vector.load %arg5[%c0_12, %c0_13] : memref<256x512xbf16, #tpu.memory_space<vmem>>, vector<256x512xbf16>
      tpu.vector_store %arg5[%c0_12, %c0_13], %13 {strides = array<i32>} : memref<256x512xbf16, #tpu.memory_space<vmem>>, vector<256x512xbf16>,
    } else {
    }
    return
  }
  func.func @transform_0(%arg0: i32, %arg1: i32, %arg2: i32) -> (i32, i32) {
    %c0_i32 = arith.constant 0 : i32
    return %arg0, %arg2 : i32, i32
  }
  func.func @transform_1(%arg0: i32, %arg1: i32, %arg2: i32) -> (i32, i32) {
    %c0_i32 = arith.constant 0 : i32
    return %arg2, %arg1 : i32, i32
  }
  func.func @transform_2(%arg0: i32, %arg1: i32, %arg2: i32) -> (i32, i32) {
    %c0_i32 = arith.constant 0 : i32
    return %arg0, %arg1 : i32, i32
  }
}

</mosaic_0001>

<bundles_post_ra>
// kernel: tpu_custom_call.1
= control target key start
LH: loop header
LB: loop body
LE: loop exit
PB: predicated region body
PF: predicated region fallthrough
CT: control target
= control target key end

     0   :  { %s5141_s0 = inlined_call_operand.hbm [shape: bf16[512,512], index: 0, kind: input, shape index: {}]   ;;  %s5142_s1 = inlined_call_operand.hbm [shape: bf16[512,1024], index: 1, kind: input, shape index: {}]   ;;  %s5143_s2 = inlined_call_operand.hbm [shape: bf16[512,1024], index: 2, kind: output, shape index: {}]  }
   0x1   :  { %5157 = sst [smem:[#allocation18_spill]] %s5141_s0 }
   0x2   :  { %5158 = sst [smem:[#allocation19_spill]] %s5143_s2 }
   0x3   :  { %7 = vsyncpa [#allocation4], 0 }
   0x4   :  { %9 = vsyncpa [#allocation4 + $0x1], 0 }
   0x5   :  { %10 = vsyncpa [#allocation7], 0 }
   0x6   :  { %12 = vsyncpa [#allocation7 + $0x1], 0 }
   0x7   :  { %13 = vsyncpa [#allocation5], 0 }
   0x8   :  { %15 = vsyncpa [#allocation5 + $0x1], 0  ;;  %s4529_s9 = smov 0   ;;  %s4531_s10 = smov 0  }
   0x9   :  { %s4533_s11 = smov 0   ;;  %s4535_s12 = smov 0  }
   0xa   :  { %s4537_s13 = smov 0   ;;  %s4539_s14 = smov 0  }
   0xb   :  { %s4541_s15 = smov 0   ;;  %s4543_s16 = smov 0  }
   0xc   :  { %s4545_s17 = smov 0   ;;  %s4547_s18 = smov 0  }
   0xd   :  { %s4549_s19 = smov 0   ;;  %s4551_s20 = smov 0  }
   0xe   :  { %s4553_s21 = smov 0   ;;  %s4555_s22 = smov 0  }
   0xf LB: > { %5159 = sst [smem:[#allocation12_spill]] %s4491_s19  ;;  %s3394_s23 = sadd.s32 4294967295, %s4503_s22   ;;  %s4503_s22 = sphi %s4555_s22, %s21_s22   ;;  %s4499_s21 = sphi %s4553_s21, %s5193_s21   ;;  %s4495_s20 = sphi %s4551_s20, %s5204_s20   ;;  %s4491_s19 = sphi %s4549_s19, %s5191_s19   ;;  %s4487_s18 = sphi %s4547_s18, %s5203_s18   ;;  %s4483_s17 = sphi %s4545_s17, %s5202_s17   ;;  %s4479_s16 = sphi %s4543_s16, %s5201_s16   ;;  %s4475_s15 = sphi %s4541_s15, %s5200_s15   ;;  %s4471_s14 = sphi %s4539_s14, %s5199_s14   ;;  %s4467_s13 = sphi %s4537_s13, %s5198_s13   ;;  %s4463_s12 = sphi %s4535_s12, %s5197_s12   ;;  %s4459_s11 = sphi %s4533_s11, %s5196_s11   ;;  %s4455_s10 = sphi %s4531_s10, %s5195_s10   ;;  %s4451_s9 = sphi %s4529_s9, %s5194_s9  }
  0x10   : > { %5160 = sst [smem:[#allocation13_spill]] %s4499_s21  ;;  %s40_s24 = sadd.s32 1, %s4499_s21 }
  0x11   : > { %p56_p0 = scmp.ne.s32.totalorder %s4483_s17, %s4479_s16  ;;  %p5145_p1 = scmp.eq.s32.totalorder %s4503_s22, 0 }
  0x12   : > { %p62_p2 = scmp.ne.s32.totalorder %s4479_s16, %s4475_s15  ;;  %p4604_p3 = scmp.eq.s32.totalorder %s3394_s23, 0 }
  0x13   : > { %p4608_p4 = scmp.eq.s32.totalorder %s3394_s23, 3  ;;  %p58_p5 = por %p5145_p1, %p56_p0 }
  0x14   : > { %p4616_p6 = por %p4604_p3, %p62_p2  ;;  %p5144_p7 = scmp.lt.s32.totalorder %s4503_s22, 4 }
  0x15   : > { %s5162_s27 = scalar_select %p4608_p4, 1, 0 }
  0x16   : > { %s5163_s28 = scalar_select %p4616_p6, 1, 0 }
  0x17   : > { %s142_s29 = sand.u32 1, %s4483_s17   ;;  %s3673_s30 = sshll.u32 %s4499_s21, 13 }
  0x18   : > { %s3398_s3 = sshll.u32 %s142_s29, 9  ;;  %s5164_s0 = sld [smem:[#allocation18_spill]] }
  0x19   : > { %s146_s7 = scalar_lea.vmem [#allocation3], %s3398_s3  ;;  %p4630_p8 = pnand %p5144_p7, %p58_p5 }
  0x1a   : > { %s156_s8 = sshll.u32 %s146_s7, 4  ;;  %s4636_s23 = scalar_lea.sflag [#allocation4], %s142_s29  ;;  %s4634_s8 = int_to_ptr.vmem [resolvable:$true] %s156_s8 }
  0x1b   : > { %p4295_p10 = pneg %p4630_p8 }
  0x1e   : > { %s4626_s6 = scalar_lea.hbm %s5164_s0, %s3673_s30  ;;  %s4298_s5 = scalar_lea.hbm %s5164_s0, 16384 }
  0x1f   : > { %s4293_s4 = scalar_lea.hbm %s4626_s6, 8192  ;;  %p4299_p13 = scmp.lt.u32.totalorder %s4626_s6, %s5164_s0 }
  0x20   : > { %p4294_p9 = scmp.ne.s32.totalorder %s4626_s6, %s4293_s4  ;;  %p4300_p0 = scmp.lt.u32.totalorder %s4298_s5, %s4293_s4 }
  0x21   : > { %p4302_p5 = scmp.lt.u32.totalorder %s4293_s4, %s4626_s6 }
  0x22   : > { %p4296_p11 = pnand %p4295_p10, %p4294_p9  ;;  %p4301_p2 = por %p4300_p0, %p4299_p13 }
  0x24   : > { %p4297_p12 = pneg %p4296_p11  ;;  %p4303_p7 = por %p4302_p5, %p4301_p2 }
  0x26   : > { %p4304_p1 = pnand %p4303_p7, %p4297_p12 }
  0x28   : > { %4307 = shalt.err (!%p4304_p1)
}
  0x29   : > { %s4308_s29 = scalar_lea.vmem %s4634_s8, 8192  ;;  %s4505_s30 = smov [#allocation3]  }
  0x2a   : > { %p4309_p9 = scmp.ne.s32.totalorder %s4634_s8, %s4308_s29  ;;  %s4313_s3 = sshll.u32 %s4505_s30, 4  ;;  %s4314_s3 = int_to_ptr.vmem [resolvable:$false] %s4313_s3 }
  0x2b   : > { %s4315_s25 = scalar_lea.vmem %s4314_s3, 16384  ;;  %p4316_p4 = scmp.lt.s32.totalorder %s4634_s8, %s4314_s3 }
  0x2c   : > { %p4311_p11 = pnand %p4309_p9, %p4295_p10  ;;  %p4317_p13 = scmp.lt.s32.totalorder %s4315_s25, %s4308_s29 }
  0x2e   : > { %p4312_p6 = pneg %p4311_p11  ;;  %p4318_p0 = por %p4317_p13, %p4316_p4 }
  0x30   : > { %p4319_p2 = pnand %p4318_p0, %p4312_p6 }
  0x32   : > { %4322 = shalt.err (!%p4319_p2)
}
  0x33   : > { %s5147_s4 = smov 256   ;;  %s5148_s5 = smov 16  }
  0x34   : > { %3877 = dma.hbm_to_vmem [thread:$0]  (!%p4630_p8), %s4626_s6, 8192, %s4634_s8, %s4636_s23, %s5147_s4, %s5147_s4, %s5148_s5  }
  0x35   : > { %p3405_p1 = scmp.ge.s32.totalorder %s4503_s22, 1  ;;  %p188_p4 = scmp.lt.s32.totalorder %s4503_s22, 5 }
  0x36   : > { %s3395_s29 = sadd.s32 4294967294, %s4503_s22   ;;  %s36_s30 = sadd.s32 1, %s4495_s20 }
  0x37   : > { %p4669_p6 = pnand %p3405_p1, %p188_p4  ;;  %s77_s3 = sadd.s32 1, %s4471_s14 }
  0x38   : > { %p38_p7 = scmp.ge.s32.totalorder %s36_s30, 2  ;;  %p84_p10 = scmp.ne.s32.totalorder %s4471_s14, %s4467_s13 }
  0x39   : > { %p90_p12 = scmp.ne.s32.totalorder %s4467_s13, %s4463_s12  ;;  %s105_s15 = sadd.s32 1, %s4459_s11 }
  0x3a   : > { %s5206_s30 = smov (%p38_p7, %s36_s30), 0  ;;  %s5208_s24 = smov (!%p38_p7, %s40_s24), %s4499_s21 }
  0x3b   : > { %5167 = sst [smem:[#allocation14_spill]] %s5206_s30  ;;  %s73_s6 = ssub.s32 %s4495_s20, %s5206_s30 }
  0x3c   : > { %p5168_p8 = scmp.eq.s32.totalorder %s4503_s22, 0  ;;  %p42_p9 = scmp.ge.s32.totalorder %s5208_s24, 2 }
  0x3d   : > { %p75_p11 = scmp.eq.s32.totalorder %s73_s6, 0  ;;  %p4696_p13 = por %p90_p12, %p4604_p3 }
  0x3e   : > { %p4690_p5 = por %p84_p10, %p5168_p8  ;;  %p115_p0 = scmp.ne.s32.totalorder %s4459_s11, %s4455_s10 }
  0x3f   : > { %s5170_s12 = scalar_select %p4696_p13, 1, 0 }
  0x40   : > { %s5210_s24 = smov (%p42_p9, %s5208_s24), 0  ;;  %p5173_p2 = scmp.ne.s32.totalorder %s5162_s27, 0 }
  0x41   : > { %5171 = sst [smem:[#allocation15_spill]] %s5210_s24  ;;  %s44_s25 = ssub.s32 %s4499_s21, %s5210_s24 }
  0x42   : > { %s4705_s23 = scalar_select %p75_p11, %s4471_s14, %s77_s3  }
  0x43   : > { %p4711_p1 = por %p5173_p2, %p115_p0  ;;  %p47_p4 = scmp.eq.s32.totalorder %s44_s25, 0 }
  0x44   : > { %5172 = sst [smem:[#allocation16_spill]] %s4705_s23  ;;  %s102_s26 = sor.u32 %s73_s6, %s44_s25 }
  0x45   : > { %s5174_s4 = scalar_select %p4711_p1, 1, 0 }
  0x46   : > { %p103_p3 = scmp.eq.s32.totalorder %s102_s26, 0  ;;  %p121_p7 = scmp.ne.s32.totalorder %s4455_s10, %s4451_s9 }
  0x47   : > { %5175 = sst [smem:[#allocation17_spill]] %s5174_s4  ;;  %s5176_s5 = sadd.s32 1, %s4483_s17 }
  0x48   : > { %s4720_s0 = scalar_select %p47_p4, %s4483_s17, %s5176_s5  }
  0x49   : > { %s4723_s30 = scalar_select %p103_p3, %s4459_s11, %s105_s15  }
  0x4a   : > { %p122_p10 = scmp.eq.s32.totalorder %s3395_s29, 3  ;;  %s166_s3 = sand.u32 1, %s4471_s14  }
  0x4b   : > { %s3402_s23 = sshll.u32 %s166_s3, 10  ;;  %s3674_s24 = sshll.u32 %s4495_s20, 8 }
  0x4c   : > { %p4726_p12 = por %p122_p10, %p121_p7  ;;  %s170_s21 = scalar_lea.vmem [#allocation6], %s3402_s23 }
  0x4d   : > { %s180_s2 = sshll.u32 %s170_s21, 4  ;;  %s4734_s6 = scalar_lea.hbm %s5142_s1, %s3674_s24  ;;  %s4736_s2 = int_to_ptr.vmem [resolvable:$true] %s180_s2 }
  0x4e   : > { %s5177_s27 = scalar_select %p4726_p12, 1, 0 }
  0x4f   : > { %p5178_p8 = scmp.lt.s32.totalorder %s4503_s22, 4  ;;  %s4746_s21 = scalar_lea.sflag [#allocation7], %s166_s3 }
  0x50   : > { %s4323_s29 = scalar_lea.hbm %s4734_s6, 16384  ;;  %s4328_s4 = scalar_lea.hbm %s5142_s1, 32768 }
  0x51   : > { %p4742_p9 = pnand %p5178_p8, %p4690_p5  ;;  %p4324_p11 = scmp.ne.s32.totalorder %s4734_s6, %s4323_s29 }
  0x52   : > { %p4329_p5 = scmp.lt.u32.totalorder %s4734_s6, %s5142_s1  ;;  %p4330_p3 = scmp.lt.u32.totalorder %s4328_s4, %s4323_s29 }
  0x53   : > { %p4325_p0 = pneg %p4742_p9  ;;  %p4332_p10 = scmp.lt.u32.totalorder %s4323_s29, %s4734_s6 }
  0x54   : > { %p4331_p7 = por %p4330_p3, %p4329_p5 }
  0x55   : > { %p4326_p2 = pnand %p4325_p0, %p4324_p11 }
  0x56   : > { %p4333_p8 = por %p4332_p10, %p4331_p7 }
  0x57   : > { %p4327_p4 = pneg %p4326_p2 }
  0x59   : > { %p4334_p12 = pnand %p4333_p8, %p4327_p4 }
  0x5b   : > { %4337 = shalt.err (!%p4334_p12)
}
  0x5c   : > { %s4338_s23 = scalar_lea.vmem %s4736_s2, 16384  ;;  %s4508_s25 = smov [#allocation6]  }
  0x5d   : > { %p4339_p11 = scmp.ne.s32.totalorder %s4736_s2, %s4338_s23  ;;  %s4343_s26 = sshll.u32 %s4508_s25, 4  ;;  %s4344_s26 = int_to_ptr.vmem [resolvable:$false] %s4343_s26 }
  0x5e   : > { %s4345_s3 = scalar_lea.vmem %s4344_s26, 32768  ;;  %p4346_p13 = scmp.lt.s32.totalorder %s4736_s2, %s4344_s26 }
  0x5f   : > { %p4341_p2 = pnand %p4339_p11, %p4325_p0  ;;  %p4347_p5 = scmp.lt.s32.totalorder %s4345_s3, %s4338_s23 }
  0x61   : > { %p4342_p1 = pneg %p4341_p2  ;;  %p4348_p3 = por %p4347_p5, %p4346_p13 }
  0x63   : > { %p4349_p7 = pnand %p4348_p3, %p4342_p1 }
  0x65   : > { %4352 = shalt.err (!%p4349_p7)
}
  0x66   : > { %s4509_s29 = smov 512   ;;  %s5180_s19 = smov 16  }
  0x67   : > { %s5181_s24 = smov 256   ;;  %192 = sbr.rel (%p4669_p6) target bundleno = 661 (0x295), region = 28 }
  0x68   : > { %3880 = dma.hbm_to_vmem [thread:$0]  (!%p4742_p9), %s4734_s6, 16384, %s4736_s2, %s4746_s21, %s4509_s29, %s5181_s24, %s5180_s19  }
  0x69   : > { %s194_s4 = sand.u32 (!%p4669_p6), 1, %s4479_s16   ;;  %p5182_p13 = scmp.ne.s32.totalorder (!%p4669_p6), %s5163_s28, 0 }
  0x6a   : > { %s3406_s15 = sshll.u32 (!%p4669_p6), %s194_s4, 9  ;;  %s195_s8 = scalar_lea.sflag (!%p4669_p6), [#allocation4], %s194_s4 }
  0x6b   : > { %s4779_s23 = scalar_lea.vmem (!%p4669_p6), [#allocation3], %s3406_s15 }
  0x6e   : > { %4438 = dma.done.wait (%p5182_p13), %s195_s8, 8192  }
  0x6f   : > { %4440 = vsyncadd (%p5182_p13), %s195_s8, 4294959104  ;;  %s203_s5 = sand.u32 1, %s4467_s13   ;;  %p5183_p6 = scmp.ne.s32.totalorder %s5170_s12, 0 }
  0x70   : > { %s3407_s25 = sshll.u32 %s203_s5, 10  ;;  %s204_s2 = scalar_lea.sflag [#allocation7], %s203_s5 }
  0x71   : > { %s4786_s6 = scalar_lea.vmem [#allocation6], %s3407_s25 }
  0x72   : > { %4442 = dma.done.wait (%p5183_p6), %s204_s2, 16384  }
  0x73   : > { %4444 = vsyncadd (%p5183_p6), %s204_s2, 4294950912  ;;  %v4005_v0 = vld [vmem:[%s4786_s6 + $0x4] ss:$16 sps:$4 sm:$0xff]   ;;  %v4007_v1 = vld [vmem:[%s4786_s6 + $0xc] ss:$16 sps:$4 sm:$0xff]   ;;  %s230_s28 = sand.u32 1, %s4455_s10  }
  0x74   : > { %1651 = vmatprep.subr.bf16.mxu0 %v4005_v0  ;;  %v4009_v2 = vld [vmem:[%s4786_s6] ss:$16 sps:$4 sm:$0xff]   ;;  %v4010_v3 = vld [vmem:[%s4786_s6 + $0x8] ss:$16 sps:$4 sm:$0xff]   ;;  %2037 = vmatprep.subr.bf16.mxu1 %v4007_v1  ;;  %v4011_v4 = vld [vmem:[%s4786_s6 + $0x24] ss:$16 sps:$4 sm:$0xff]  }
  0x75   : > { %1652 = vmatpush1.bf16.msra.mxu0 %v4009_v2  ;;  %2038 = vmatpush1.bf16.msra.mxu1 %v4010_v3  ;;  %v4013_v5 = vld [vmem:[%s4786_s6 + $0x2c] ss:$16 sps:$4 sm:$0xff]   ;;  %v4015_v6 = vld [vmem:[%s4786_s6 + $0x20] ss:$16 sps:$4 sm:$0xff]   ;;  %v4016_v7 = vld [vmem:[%s4786_s6 + $0x28] ss:$16 sps:$4 sm:$0xff]  }
  0x76   : > { %1653 = vmatprep.subr.bf16.mxu0 %v4011_v4  ;;  %2039 = vmatprep.subr.bf16.mxu1 %v4013_v5  ;;  %v4017_v8 = vld [vmem:[%s4786_s6 + $0x44] ss:$16 sps:$4 sm:$0xff]   ;;  %v4019_v9 = vld [vmem:[%s4786_s6 + $0x4c] ss:$16 sps:$4 sm:$0xff]   ;;  %v4021_v10 = vld [vmem:[%s4786_s6 + $0x40] ss:$16 sps:$4 sm:$0xff]  }
  0x77   : > { %v4022_v11 = vld [vmem:[%s4786_s6 + $0x48] ss:$16 sps:$4 sm:$0xff]   ;;  %v4023_v12 = vld [vmem:[%s4786_s6 + $0x64] ss:$16 sps:$4 sm:$0xff]   ;;  %v4025_v13 = vld [vmem:[%s4786_s6 + $0x6c] ss:$16 sps:$4 sm:$0xff]  }
  0x78   : > { %v4027_v14 = vld [vmem:[%s4786_s6 + $0x60] ss:$16 sps:$4 sm:$0xff]   ;;  %v4028_v15 = vld [vmem:[%s4786_s6 + $0x68] ss:$16 sps:$4 sm:$0xff]   ;;  %v4029_v16 = vld [vmem:[%s4786_s6 + $0x84] ss:$16 sps:$4 sm:$0xff]  }
  0x79   : > { %1654 = vmatpush1.bf16.msra.mxu0 %v4015_v6  ;;  %2040 = vmatpush1.bf16.msra.mxu1 %v4016_v7  ;;  %v4031_v17 = vld [vmem:[%s4786_s6 + $0x8c] ss:$16 sps:$4 sm:$0xff]   ;;  %v4033_v18 = vld [vmem:[%s4786_s6 + $0x80] ss:$16 sps:$4 sm:$0xff]   ;;  %v4034_v19 = vld [vmem:[%s4786_s6 + $0x88] ss:$16 sps:$4 sm:$0xff]  }
  0x7a   : > { %1655 = vmatprep.subr.bf16.mxu0 %v4017_v8  ;;  %2041 = vmatprep.subr.bf16.mxu1 %v4019_v9  ;;  %v4035_v20 = vld [vmem:[%s4786_s6 + $0xa4] ss:$16 sps:$4 sm:$0xff]   ;;  %v4037_v21 = vld [vmem:[%s4786_s6 + $0xac] ss:$16 sps:$4 sm:$0xff]   ;;  %v4039_v22 = vld [vmem:[%s4786_s6 + $0xa0] ss:$16 sps:$4 sm:$0xff]  }
  0x7b   : > { %v4040_v23 = vld [vmem:[%s4786_s6 + $0xa8] ss:$16 sps:$4 sm:$0xff]   ;;  %v4041_v24 = vld [vmem:[%s4786_s6 + $0xc4] ss:$16 sps:$4 sm:$0xff]   ;;  %v4043_v25 = vld [vmem:[%s4786_s6 + $0xcc] ss:$16 sps:$4 sm:$0xff]  }
  0x7c   : > { %v4045_v26 = vld [vmem:[%s4786_s6 + $0xc0] ss:$16 sps:$4 sm:$0xff]   ;;  %v4046_v27 = vld [vmem:[%s4786_s6 + $0xc8] ss:$16 sps:$4 sm:$0xff]   ;;  %v4047_v28 = vld [vmem:[%s4786_s6 + $0xe4] ss:$16 sps:$4 sm:$0xff]  }
  0x7d   : > { %1656 = vmatpush1.bf16.msra.mxu0 %v4021_v10  ;;  %2042 = vmatpush1.bf16.msra.mxu1 %v4022_v11  ;;  %v4049_v29 = vld [vmem:[%s4786_s6 + $0xec] ss:$16 sps:$4 sm:$0xff]   ;;  %v4051_v30 = vld [vmem:[%s4786_s6 + $0xe0] ss:$16 sps:$4 sm:$0xff]   ;;  %v4052_v31 = vld [vmem:[%s4786_s6 + $0xe8] ss:$16 sps:$4 sm:$0xff]  }
  0x7e   : > { %1657 = vmatprep.subr.bf16.mxu0 %v4023_v12  ;;  %2043 = vmatprep.subr.bf16.mxu1 %v4025_v13  ;;  %v4053_v32 = vld [vmem:[%s4786_s6 + $0x104] ss:$16 sps:$4 sm:$0xff]   ;;  %v4055_v33 = vld [vmem:[%s4786_s6 + $0x10c] ss:$16 sps:$4 sm:$0xff]   ;;  %v4057_v34 = vld [vmem:[%s4786_s6 + $0x100] ss:$16 sps:$4 sm:$0xff]  }
  0x7f   : > { %v4058_v35 = vld [vmem:[%s4786_s6 + $0x108] ss:$16 sps:$4 sm:$0xff]   ;;  %v4059_v36 = vld [vmem:[%s4786_s6 + $0x124] ss:$16 sps:$4 sm:$0xff]   ;;  %v4061_v37 = vld [vmem:[%s4786_s6 + $0x12c] ss:$16 sps:$4 sm:$0xff]  }
  0x80   : > { %v4063_v38 = vld [vmem:[%s4786_s6 + $0x120] ss:$16 sps:$4 sm:$0xff]   ;;  %v4064_v39 = vld [vmem:[%s4786_s6 + $0x128] ss:$16 sps:$4 sm:$0xff]   ;;  %v4065_v40 = vld [vmem:[%s4786_s6 + $0x144] ss:$16 sps:$4 sm:$0xff]  }
  0x81   : > { %1658 = vmatpush1.bf16.msra.mxu0 %v4027_v14  ;;  %2044 = vmatpush1.bf16.msra.mxu1 %v4028_v15  ;;  %v4067_v41 = vld [vmem:[%s4786_s6 + $0x14c] ss:$16 sps:$4 sm:$0xff]   ;;  %v4069_v42 = vld [vmem:[%s4786_s6 + $0x140] ss:$16 sps:$4 sm:$0xff]   ;;  %v4070_v43 = vld [vmem:[%s4786_s6 + $0x148] ss:$16 sps:$4 sm:$0xff]  }
  0x82   : > { %1659 = vmatprep.subr.bf16.mxu0 %v4029_v16  ;;  %2045 = vmatprep.subr.bf16.mxu1 %v4031_v17  ;;  %v4071_v44 = vld [vmem:[%s4786_s6 + $0x164] ss:$16 sps:$4 sm:$0xff]   ;;  %v4073_v45 = vld [vmem:[%s4786_s6 + $0x16c] ss:$16 sps:$4 sm:$0xff]   ;;  %v4075_v46 = vld [vmem:[%s4786_s6 + $0x160] ss:$16 sps:$4 sm:$0xff]  }
  0x83   : > { %v4076_v47 = vld [vmem:[%s4786_s6 + $0x168] ss:$16 sps:$4 sm:$0xff]   ;;  %v4103_v48 = vld [vmem:[%s4779_s23 + $0x4] ss:$16 sps:$4 sm:$0xff]   ;;  %v4079_v50 = vld [vmem:[%s4786_s6 + $0x18c] ss:$16 sps:$4 sm:$0xff]  }
  0x84   : > { %v4077_v49 = vld [vmem:[%s4786_s6 + $0x184] ss:$16 sps:$4 sm:$0xff]   ;;  %1683 = vmatprep.mubr.bf16.mxu0 %v4103_v48  ;;  %2069 = vmatprep.mubr.bf16.mxu1 %v4103_v48  ;;  %v4081_v51 = vld [vmem:[%s4786_s6 + $0x180] ss:$16 sps:$4 sm:$0xff]   ;;  %v4082_v52 = vld [vmem:[%s4786_s6 + $0x188] ss:$16 sps:$4 sm:$0xff]  }
  0x85   : > { %1660 = vmatpush1.bf16.msra.mxu0 %v4033_v18  ;;  %2046 = vmatpush1.bf16.msra.mxu1 %v4034_v19  ;;  %v4083_v53 = vld [vmem:[%s4786_s6 + $0x1a4] ss:$16 sps:$4 sm:$0xff]   ;;  %v4085_v54 = vld [vmem:[%s4786_s6 + $0x1ac] ss:$16 sps:$4 sm:$0xff]   ;;  %v4087_v55 = vld [vmem:[%s4786_s6 + $0x1a0] ss:$16 sps:$4 sm:$0xff]  }
  0x86   : > { %1661 = vmatprep.subr.bf16.mxu0 %v4035_v20  ;;  %2047 = vmatprep.subr.bf16.mxu1 %v4037_v21  ;;  %v4088_v56 = vld [vmem:[%s4786_s6 + $0x1a8] ss:$16 sps:$4 sm:$0xff]   ;;  %v4089_v57 = vld [vmem:[%s4786_s6 + $0x1c4] ss:$16 sps:$4 sm:$0xff]   ;;  %v4091_v58 = vld [vmem:[%s4786_s6 + $0x1cc] ss:$16 sps:$4 sm:$0xff]  }
  0x87   : > { %v4093_v59 = vld [vmem:[%s4786_s6 + $0x1c0] ss:$16 sps:$4 sm:$0xff]   ;;  %v4094_v60 = vld [vmem:[%s4786_s6 + $0x1c8] ss:$16 sps:$4 sm:$0xff]   ;;  %v4095_v61 = vld [vmem:[%s4786_s6 + $0x1e4] ss:$16 sps:$4 sm:$0xff]  }
  0x88   : > { %v4097_v62 = vld [vmem:[%s4786_s6 + $0x1ec] ss:$16 sps:$4 sm:$0xff]   ;;  %v4099_v63 = vld [vmem:[%s4786_s6 + $0x1e0] ss:$16 sps:$4 sm:$0xff]   ;;  %v4100_v0 = vld [vmem:[%s4786_s6 + $0x1e8] ss:$16 sps:$4 sm:$0xff]  }
  0x89   : > { %1662 = vmatpush1.bf16.msra.mxu0 %v4039_v22  ;;  %2048 = vmatpush1.bf16.msra.mxu1 %v4040_v23  ;;  %v4106_v1 = vld [vmem:[%s4786_s6 + $0x204] ss:$16 sps:$4 sm:$0xff]   ;;  %v4109_v2 = vld [vmem:[%s4786_s6 + $0x20c] ss:$16 sps:$4 sm:$0xff]   ;;  %v4101_v3 = vld [vmem:[%s4779_s23] ss:$16 sps:$4 sm:$0xff]  }
  0x8a   : > { %1663 = vmatprep.subr.bf16.mxu0 %v4041_v24  ;;  %2049 = vmatprep.subr.bf16.mxu1 %v4043_v25  ;;  %v4104_v4 = vld [vmem:[%s4786_s6 + $0x200] ss:$16 sps:$4 sm:$0xff]   ;;  %v4107_v5 = vld [vmem:[%s4786_s6 + $0x208] ss:$16 sps:$4 sm:$0xff]   ;;  %v4110_v6 = vld [vmem:[%s4779_s23 + $0x24] ss:$16 sps:$4 sm:$0xff]  }
  0x8b   : > { %v4115_v7 = vld [vmem:[%s4786_s6 + $0x224] ss:$16 sps:$4 sm:$0xff]   ;;  %v4118_v8 = vld [vmem:[%s4786_s6 + $0x22c] ss:$16 sps:$4 sm:$0xff]   ;;  %v4113_v9 = vld [vmem:[%s4786_s6 + $0x220] ss:$16 sps:$4 sm:$0xff]  }
  0x8c   : > { %v4116_v10 = vld [vmem:[%s4786_s6 + $0x228] ss:$16 sps:$4 sm:$0xff]   ;;  %v4124_v11 = vld [vmem:[%s4786_s6 + $0x244] ss:$16 sps:$4 sm:$0xff]   ;;  %v4127_v12 = vld [vmem:[%s4786_s6 + $0x24c] ss:$16 sps:$4 sm:$0xff]  }
  0x8d   : > { %1664 = vmatpush1.bf16.msra.mxu0 %v4045_v26  ;;  %2050 = vmatpush1.bf16.msra.mxu1 %v4046_v27  ;;  %v4112_v13 = vld [vmem:[%s4779_s23 + $0x20] ss:$16 sps:$4 sm:$0xff]   ;;  %v4119_v14 = vld [vmem:[%s4779_s23 + $0x44] ss:$16 sps:$4 sm:$0xff]   ;;  %v4125_v16 = vld [vmem:[%s4786_s6 + $0x248] ss:$16 sps:$4 sm:$0xff]  }
  0x8e   : > { %1665 = vmatprep.subr.bf16.mxu0 %v4047_v28  ;;  %2051 = vmatprep.subr.bf16.mxu1 %v4049_v29  ;;  %v4122_v15 = vld [vmem:[%s4786_s6 + $0x240] ss:$16 sps:$4 sm:$0xff]   ;;  %v4133_v17 = vld [vmem:[%s4786_s6 + $0x264] ss:$16 sps:$4 sm:$0xff]   ;;  %v4136_v18 = vld [vmem:[%s4786_s6 + $0x26c] ss:$16 sps:$4 sm:$0xff]  }
  0x8f   : > { %v4131_v19 = vld [vmem:[%s4786_s6 + $0x260] ss:$16 sps:$4 sm:$0xff]   ;;  %v4134_v20 = vld [vmem:[%s4786_s6 + $0x268] ss:$16 sps:$4 sm:$0xff]   ;;  %v4142_v21 = vld [vmem:[%s4786_s6 + $0x284] ss:$16 sps:$4 sm:$0xff]  }
  0x90   : > { %v4145_v22 = vld [vmem:[%s4786_s6 + $0x28c] ss:$16 sps:$4 sm:$0xff]   ;;  %v4121_v23 = vld [vmem:[%s4779_s23 + $0x40] ss:$16 sps:$4 sm:$0xff]   ;;  %v4128_v24 = vld [vmem:[%s4779_s23 + $0x64] ss:$16 sps:$4 sm:$0xff]  }
  0x91   : > { %1666 = vmatpush1.bf16.msra.mxu0 %v4051_v30  ;;  %2052 = vmatpush1.bf16.msra.mxu1 %v4052_v31  ;;  %v4140_v25 = vld [vmem:[%s4786_s6 + $0x280] ss:$16 sps:$4 sm:$0xff]   ;;  %v4143_v26 = vld [vmem:[%s4786_s6 + $0x288] ss:$16 sps:$4 sm:$0xff]   ;;  %v4151_v27 = vld [vmem:[%s4786_s6 + $0x2a4] ss:$16 sps:$4 sm:$0xff]  }
  0x92   : > { %1667 = vmatprep.subr.bf16.mxu0 %v4053_v32  ;;  %2053 = vmatprep.subr.bf16.mxu1 %v4055_v33  ;;  %v4154_v28 = vld [vmem:[%s4786_s6 + $0x2ac] ss:$16 sps:$4 sm:$0xff]   ;;  %v4149_v29 = vld [vmem:[%s4786_s6 + $0x2a0] ss:$16 sps:$4 sm:$0xff]   ;;  %v4152_v30 = vld [vmem:[%s4786_s6 + $0x2a8] ss:$16 sps:$4 sm:$0xff]  }
  0x93   : > { %v4160_v31 = vld [vmem:[%s4786_s6 + $0x2c4] ss:$16 sps:$4 sm:$0xff]   ;;  %v4163_v32 = vld [vmem:[%s4786_s6 + $0x2cc] ss:$16 sps:$4 sm:$0xff]   ;;  %v4130_v33 = vld [vmem:[%s4779_s23 + $0x60] ss:$16 sps:$4 sm:$0xff]  }
  0x94   : > { %v4190_v48 = vld [vmem:[%s4786_s6 + $0x32c] ss:$16 sps:$4 sm:$0xff]   ;;  %s3408_s7 = sshll.u32 %s230_s28, 9  ;;  %s5184_s21 = sld [smem:[#allocation12_spill]] }
  0x95   : > { %1668 = vmatpush1.bf16.msra.mxu0 %v4057_v34  ;;  %2054 = vmatpush1.bf16.msra.mxu1 %v4058_v35  ;;  %v4137_v34 = vld [vmem:[%s4779_s23 + $0x84] ss:$16 sps:$4 sm:$0xff]   ;;  %v4158_v35 = vld [vmem:[%s4786_s6 + $0x2c0] ss:$16 sps:$4 sm:$0xff]   ;;  %s4987_s12 = scalar_lea.vmem [#allocation8], %s3408_s7  ;;  %s3667_s26 = sshll.u32 %s4487_s18, 2 }
  0x96   : > { %1669 = vmatprep.subr.bf16.mxu0 %v4059_v36  ;;  %2055 = vmatprep.subr.bf16.mxu1 %v4061_v37  ;;  %v4161_v36 = vld [vmem:[%s4786_s6 + $0x2c8] ss:$16 sps:$4 sm:$0xff]   ;;  %v4169_v37 = vld [vmem:[%s4786_s6 + $0x2e4] ss:$16 sps:$4 sm:$0xff]   ;;  %s3275_s18 = sshll.u32 %s4987_s12, 4  ;;  %s5185_s24 = sld [smem:[#allocation17_spill]]  ;;  %s5057_s18 = int_to_ptr.vmem [resolvable:$true] %s3275_s18 }
  0x97   : > { %s5186_s8 = sld [smem:[#allocation19_spill]]  ;;  %s5065_s5 = scalar_lea.sflag [#allocation5], %s230_s28 }
  0x98   : > { %s4353_s25 = scalar_lea.vmem %s5057_s18, 8192  ;;  %s4510_s2 = smov [#allocation8]  }
  0x99   : > { %1670 = vmatpush1.bf16.msra.mxu0 %v4063_v38  ;;  %2056 = vmatpush1.bf16.msra.mxu1 %v4064_v39  ;;  %v4172_v38 = vld [vmem:[%s4786_s6 + $0x2ec] ss:$16 sps:$4 sm:$0xff]   ;;  %v4167_v39 = vld [vmem:[%s4786_s6 + $0x2e0] ss:$16 sps:$4 sm:$0xff]   ;;  %p4354_p1 = scmp.ne.s32.totalorder %s5057_s18, %s4353_s25 }
  0x9a   : > { %1671 = vmatprep.subr.bf16.mxu0 %v4065_v40  ;;  %2057 = vmatprep.subr.bf16.mxu1 %v4067_v41  ;;  %v4170_v40 = vld [vmem:[%s4786_s6 + $0x2e8] ss:$16 sps:$4 sm:$0xff]   ;;  %v4178_v41 = vld [vmem:[%s4786_s6 + $0x304] ss:$16 sps:$4 sm:$0xff]   ;;  %s3739_s3 = sshll.u32 %s5184_s21, 8 }
  0x9b   : > { %s3272_s29 = sadd.s32 %s3739_s3, %s3667_s26 }
  0x9c   : > { %s3669_s19 = sshll.u32 %s3272_s29, 6  ;;  %p5187_p12 = scmp.ne.s32.totalorder %s5185_s24, 0 }
  0x9d   : > { %1672 = vmatpush1.bf16.msra.mxu0 %v4069_v42  ;;  %2058 = vmatpush1.bf16.msra.mxu1 %v4070_v43  ;;  %v4181_v42 = vld [vmem:[%s4786_s6 + $0x30c] ss:$16 sps:$4 sm:$0xff]   ;;  %v4139_v43 = vld [vmem:[%s4779_s23 + $0x80] ss:$16 sps:$4 sm:$0xff]  }
  0x9e   : > { %1673 = vmatprep.subr.bf16.mxu0 %v4071_v44  ;;  %2059 = vmatprep.subr.bf16.mxu1 %v4073_v45  ;;  %v4146_v44 = vld [vmem:[%s4779_s23 + $0xa4] ss:$16 sps:$4 sm:$0xff]   ;;  %v4176_v45 = vld [vmem:[%s4786_s6 + $0x300] ss:$16 sps:$4 sm:$0xff]   ;;  %p4355_p9 = pnand %p4354_p1, %p5187_p12 }
  0xa0   : > { %p4356_p0 = pneg %p4355_p9 }
  0xa1   : > { %1674 = vmatpush1.bf16.msra.mxu0 %v4075_v46  ;;  %2060 = vmatpush1.bf16.msra.mxu1 %v4076_v47  ;;  %v4179_v46 = vld [vmem:[%s4786_s6 + $0x308] ss:$16 sps:$4 sm:$0xff]   ;;  %v4187_v47 = vld [vmem:[%s4786_s6 + $0x324] ss:$16 sps:$4 sm:$0xff]  }
  0xa2   : > { %1675 = vmatprep.subr.bf16.mxu0 %v4077_v49  ;;  %2061 = vmatprep.subr.bf16.mxu1 %v4079_v50  ;;  %v4185_v49 = vld [vmem:[%s4786_s6 + $0x320] ss:$16 sps:$4 sm:$0xff]   ;;  %v4188_v50 = vld [vmem:[%s4786_s6 + $0x328] ss:$16 sps:$4 sm:$0xff]  }
  0xa5   : > { %1676 = vmatpush1.bf16.msra.mxu0 %v4081_v51  ;;  %2062 = vmatpush1.bf16.msra.mxu1 %v4082_v52  ;;  %v4196_v51 = vld [vmem:[%s4786_s6 + $0x344] ss:$16 sps:$4 sm:$0xff]   ;;  %v4199_v52 = vld [vmem:[%s4786_s6 + $0x34c] ss:$16 sps:$4 sm:$0xff]  }
  0xa6   : > { %1677 = vmatprep.subr.bf16.mxu0 %v4083_v53  ;;  %2063 = vmatprep.subr.bf16.mxu1 %v4085_v54  ;;  %v4148_v53 = vld [vmem:[%s4779_s23 + $0xa0] ss:$16 sps:$4 sm:$0xff]   ;;  %v4155_v54 = vld [vmem:[%s4779_s23 + $0xc4] ss:$16 sps:$4 sm:$0xff]  }
  0xa9   : > { %1678 = vmatpush1.bf16.msra.mxu0 %v4087_v55  ;;  %2064 = vmatpush1.bf16.msra.mxu1 %v4088_v56  ;;  %v4194_v55 = vld [vmem:[%s4786_s6 + $0x340] ss:$16 sps:$4 sm:$0xff]   ;;  %v4197_v56 = vld [vmem:[%s4786_s6 + $0x348] ss:$16 sps:$4 sm:$0xff]  }
  0xaa   : > { %1679 = vmatprep.subr.bf16.mxu0 %v4089_v57  ;;  %2065 = vmatprep.subr.bf16.mxu1 %v4091_v58  ;;  %v4205_v57 = vld [vmem:[%s4786_s6 + $0x364] ss:$16 sps:$4 sm:$0xff]   ;;  %v4208_v58 = vld [vmem:[%s4786_s6 + $0x36c] ss:$16 sps:$4 sm:$0xff]  }
  0xad   : > { %1680 = vmatpush1.bf16.msra.mxu0 %v4093_v59  ;;  %2066 = vmatpush1.bf16.msra.mxu1 %v4094_v60  ;;  %v4203_v59 = vld [vmem:[%s4786_s6 + $0x360] ss:$16 sps:$4 sm:$0xff]   ;;  %v4206_v60 = vld [vmem:[%s4786_s6 + $0x368] ss:$16 sps:$4 sm:$0xff]  }
  0xae   : > { %1681 = vmatprep.subr.bf16.mxu0 %v4095_v61  ;;  %2067 = vmatprep.subr.bf16.mxu1 %v4097_v62  ;;  %v4214_v61 = vld [vmem:[%s4786_s6 + $0x384] ss:$16 sps:$4 sm:$0xff]   ;;  %v4217_v62 = vld [vmem:[%s4786_s6 + $0x38c] ss:$16 sps:$4 sm:$0xff]  }
  0xb1   : > { %1682 = vmatpush1.bf16.msra.mxu0 %v4099_v63  ;;  %2068 = vmatpush1.bf16.msra.mxu1 %v4100_v0  ;;  %v4157_v63 = vld [vmem:[%s4779_s23 + $0xc0] ss:$16 sps:$4 sm:$0xff]   ;;  %v4164_v0 = vld [vmem:[%s4779_s23 + $0xe4] ss:$16 sps:$4 sm:$0xff]  }
  0xb2   : > { %1844 = vmatprep.subr.bf16.mxu0 %v4106_v1  ;;  %2230 = vmatprep.subr.bf16.mxu1 %v4109_v2  ;;  %v4212_v1 = vld [vmem:[%s4786_s6 + $0x380] ss:$16 sps:$4 sm:$0xff]   ;;  %v4215_v2 = vld [vmem:[%s4786_s6 + $0x388] ss:$16 sps:$4 sm:$0xff]  }
  0xb4   : > { %1684 = vmatmul.mubr.bf16.vlgmr.msra.gmra.mrb[0].mxu0 %v4101_v3  ;;  %2070 = vmatmul.mubr.bf16.vlgmr.msra.gmra.mrb[0].mxu1 %v4101_v3  ;;  %v4223_v3 = vld [vmem:[%s4786_s6 + $0x3a4] ss:$16 sps:$4 sm:$0xff]  }
  0xb5   : > { %1845 = vmatpush1.bf16.msra.mxu0 %v4104_v4  ;;  %2231 = vmatpush1.bf16.msra.mxu1 %v4107_v5  ;;  %v4226_v4 = vld [vmem:[%s4786_s6 + $0x3ac] ss:$16 sps:$4 sm:$0xff]   ;;  %v4221_v5 = vld [vmem:[%s4786_s6 + $0x3a0] ss:$16 sps:$4 sm:$0xff]  }
  0xb6   : > { %1693 = vmatprep.mubr.bf16.mxu0 %v4110_v6  ;;  %2079 = vmatprep.mubr.bf16.mxu1 %v4110_v6  ;;  %v4224_v6 = vld [vmem:[%s4786_s6 + $0x3a8] ss:$16 sps:$4 sm:$0xff]  }
  0xb7   : > { %1846 = vmatprep.subr.bf16.mxu0 %v4115_v7  ;;  %2232 = vmatprep.subr.bf16.mxu1 %v4118_v8  ;;  %v4232_v7 = vld [vmem:[%s4786_s6 + $0x3c4] ss:$16 sps:$4 sm:$0xff]   ;;  %v4166_v8 = vld [vmem:[%s4779_s23 + $0xe0] ss:$16 sps:$4 sm:$0xff]  }
  0xb9   : > { %1847 = vmatpush1.bf16.msra.mxu0 %v4113_v9  ;;  %2233 = vmatpush1.bf16.msra.mxu1 %v4116_v10  ;;  %v4235_v9 = vld [vmem:[%s4786_s6 + $0x3cc] ss:$16 sps:$4 sm:$0xff]   ;;  %v4173_v10 = vld [vmem:[%s4779_s23 + $0x104] ss:$16 sps:$4 sm:$0xff]  }
  0xba   : > { %1848 = vmatprep.subr.bf16.mxu0 %v4124_v11  ;;  %2234 = vmatprep.subr.bf16.mxu1 %v4127_v12  ;;  %v4230_v11 = vld [vmem:[%s4786_s6 + $0x3c0] ss:$16 sps:$4 sm:$0xff]   ;;  %v4233_v12 = vld [vmem:[%s4786_s6 + $0x3c8] ss:$16 sps:$4 sm:$0xff]  }
  0xbc   : > { %1694 = vmatmul.mubr.bf16.gmra.mrb[4].mxu0 %v4112_v13  ;;  %2080 = vmatmul.mubr.bf16.gmra.mrb[4].mxu1 %v4112_v13  ;;  %v4241_v13 = vld [vmem:[%s4786_s6 + $0x3e4] ss:$16 sps:$4 sm:$0xff]  }
  0xbd   : > { %1703 = vmatprep.mubr.bf16.mxu0 %v4119_v14  ;;  %2089 = vmatprep.mubr.bf16.mxu1 %v4119_v14  ;;  %v4244_v14 = vld [vmem:[%s4786_s6 + $0x3ec] ss:$16 sps:$4 sm:$0xff]  }
  0xbe   : > { %1849 = vmatpush1.bf16.msra.mxu0 %v4122_v15  ;;  %2235 = vmatpush1.bf16.msra.mxu1 %v4125_v16  ;;  %v4239_v15 = vld [vmem:[%s4786_s6 + $0x3e0] ss:$16 sps:$4 sm:$0xff]   ;;  %v4242_v16 = vld [vmem:[%s4786_s6 + $0x3e8] ss:$16 sps:$4 sm:$0xff]   ;;  %s4357_s6 = sshll.u32 %s4510_s2, 4  ;;  %s4358_s6 = int_to_ptr.vmem [resolvable:$false] %s4357_s6 }
  0xbf   : > { %1850 = vmatprep.subr.bf16.mxu0 %v4133_v17  ;;  %2236 = vmatprep.subr.bf16.mxu1 %v4136_v18  ;;  %v4175_v17 = vld [vmem:[%s4779_s23 + $0x100] ss:$16 sps:$4 sm:$0xff]   ;;  %v4182_v18 = vld [vmem:[%s4779_s23 + $0x124] ss:$16 sps:$4 sm:$0xff]   ;;  %s4359_s7 = scalar_lea.vmem %s4358_s6, 16384  ;;  %p4360_p4 = scmp.lt.s32.totalorder %s5057_s18, %s4358_s6 }
  0xc0   : > { %p4361_p10 = scmp.lt.s32.totalorder %s4359_s7, %s4353_s25 }
  0xc2   : > { %1851 = vmatpush1.bf16.msra.mxu0 %v4131_v19  ;;  %2237 = vmatpush1.bf16.msra.mxu1 %v4134_v20  ;;  %v4184_v19 = vld [vmem:[%s4779_s23 + $0x120] ss:$16 sps:$4 sm:$0xff]   ;;  %v4191_v20 = vld [vmem:[%s4779_s23 + $0x144] ss:$16 sps:$4 sm:$0xff]   ;;  %p4362_p8 = por %p4361_p10, %p4360_p4 }
  0xc3   : > { %1852 = vmatprep.subr.bf16.mxu0 %v4142_v21  ;;  %2238 = vmatprep.subr.bf16.mxu1 %v4145_v22  ;;  %v4193_v21 = vld [vmem:[%s4779_s23 + $0x140] ss:$16 sps:$4 sm:$0xff]   ;;  %v4200_v22 = vld [vmem:[%s4779_s23 + $0x164] ss:$16 sps:$4 sm:$0xff]  }
  0xc4   : > { %1704 = vmatmul.mubr.bf16.gmra.mrb[8].mxu0 %v4121_v23  ;;  %2090 = vmatmul.mubr.bf16.gmra.mrb[8].mxu1 %v4121_v23  ;;  %v4202_v23 = vld [vmem:[%s4779_s23 + $0x160] ss:$16 sps:$4 sm:$0xff]   ;;  %p4363_p11 = pnand %p4362_p8, %p4356_p0 }
  0xc5   : > { %1713 = vmatprep.mubr.bf16.mxu0 %v4128_v24  ;;  %2099 = vmatprep.mubr.bf16.mxu1 %v4128_v24  ;;  %v4209_v24 = vld [vmem:[%s4779_s23 + $0x184] ss:$16 sps:$4 sm:$0xff]  }
  0xc6   : > { %1853 = vmatpush1.bf16.msra.mxu0 %v4140_v25  ;;  %2239 = vmatpush1.bf16.msra.mxu1 %v4143_v26  ;;  %v4211_v25 = vld [vmem:[%s4779_s23 + $0x180] ss:$16 sps:$4 sm:$0xff]   ;;  %v4218_v26 = vld [vmem:[%s4779_s23 + $0x1a4] ss:$16 sps:$4 sm:$0xff]  }
  0xc7   : > { %1854 = vmatprep.subr.bf16.mxu0 %v4151_v27  ;;  %2240 = vmatprep.subr.bf16.mxu1 %v4154_v28  ;;  %v4220_v27 = vld [vmem:[%s4779_s23 + $0x1a0] ss:$16 sps:$4 sm:$0xff]   ;;  %v4227_v28 = vld [vmem:[%s4779_s23 + $0x1c4] ss:$16 sps:$4 sm:$0xff]  }
  0xca   : > { %1855 = vmatpush1.bf16.msra.mxu0 %v4149_v29  ;;  %2241 = vmatpush1.bf16.msra.mxu1 %v4152_v30  ;;  %v4229_v29 = vld [vmem:[%s4779_s23 + $0x1c0] ss:$16 sps:$4 sm:$0xff]   ;;  %v4236_v30 = vld [vmem:[%s4779_s23 + $0x1e4] ss:$16 sps:$4 sm:$0xff]  }
  0xcb   : > { %1856 = vmatprep.subr.bf16.mxu0 %v4160_v31  ;;  %2242 = vmatprep.subr.bf16.mxu1 %v4163_v32  ;;  %v4238_v31 = vld [vmem:[%s4779_s23 + $0x1e0] ss:$16 sps:$4 sm:$0xff]   ;;  %v4247_v32 = vld [vmem:[%s4779_s23 + $0xc] ss:$16 sps:$4 sm:$0xff]  }
  0xcc   : > { %1714 = vmatmul.mubr.bf16.gmra.mrb[12].mxu0 %v4130_v33  ;;  %2100 = vmatmul.mubr.bf16.gmra.mrb[12].mxu1 %v4130_v33  ;;  %v4245_v33 = vld [vmem:[%s4779_s23 + $0x8] ss:$16 sps:$4 sm:$0xff]  }
  0xcd   : > { %1723 = vmatprep.mubr.bf16.mxu0 %v4137_v34  ;;  %2109 = vmatprep.mubr.bf16.mxu1 %v4137_v34  ;;  %v4248_v34 = vld [vmem:[%s4779_s23 + $0x2c] ss:$16 sps:$4 sm:$0xff]  }
  0xce   : > { %1857 = vmatpush1.bf16.msra.mxu0 %v4158_v35  ;;  %2243 = vmatpush1.bf16.msra.mxu1 %v4161_v36  ;;  %v4250_v35 = vld [vmem:[%s4779_s23 + $0x28] ss:$16 sps:$4 sm:$0xff]   ;;  %v4251_v36 = vld [vmem:[%s4779_s23 + $0x4c] ss:$16 sps:$4 sm:$0xff]  }
  0xcf   : > { %1858 = vmatprep.subr.bf16.mxu0 %v4169_v37  ;;  %2244 = vmatprep.subr.bf16.mxu1 %v4172_v38  ;;  %v4253_v37 = vld [vmem:[%s4779_s23 + $0x48] ss:$16 sps:$4 sm:$0xff]   ;;  %v4254_v38 = vld [vmem:[%s4779_s23 + $0x6c] ss:$16 sps:$4 sm:$0xff]  }
  0xd2   : > { %1859 = vmatpush1.bf16.msra.mxu0 %v4167_v39  ;;  %2245 = vmatpush1.bf16.msra.mxu1 %v4170_v40  ;;  %v4256_v39 = vld [vmem:[%s4779_s23 + $0x68] ss:$16 sps:$4 sm:$0xff]   ;;  %v4257_v40 = vld [vmem:[%s4779_s23 + $0x8c] ss:$16 sps:$4 sm:$0xff]  }
  0xd3   : > { %1860 = vmatprep.subr.bf16.mxu0 %v4178_v41  ;;  %2246 = vmatprep.subr.bf16.mxu1 %v4181_v42  ;;  %v4259_v41 = vld [vmem:[%s4779_s23 + $0x88] ss:$16 sps:$4 sm:$0xff]   ;;  %v4260_v42 = vld [vmem:[%s4779_s23 + $0xac] ss:$16 sps:$4 sm:$0xff]  }
  0xd4   : > { %1724 = vmatmul.mubr.bf16.gmra.mrb[16].mxu0 %v4139_v43  ;;  %2110 = vmatmul.mubr.bf16.gmra.mrb[16].mxu1 %v4139_v43  ;;  %v4262_v43 = vld [vmem:[%s4779_s23 + $0xa8] ss:$16 sps:$4 sm:$0xff]  }
  0xd5   : > { %1733 = vmatprep.mubr.bf16.mxu0 %v4146_v44  ;;  %2119 = vmatprep.mubr.bf16.mxu1 %v4146_v44  ;;  %v4263_v44 = vld [vmem:[%s4779_s23 + $0xcc] ss:$16 sps:$4 sm:$0xff]  }
  0xd6   : > { %1861 = vmatpush1.bf16.msra.mxu0 %v4176_v45  ;;  %2247 = vmatpush1.bf16.msra.mxu1 %v4179_v46  ;;  %v4265_v45 = vld [vmem:[%s4779_s23 + $0xc8] ss:$16 sps:$4 sm:$0xff]   ;;  %v4266_v46 = vld [vmem:[%s4779_s23 + $0xec] ss:$16 sps:$4 sm:$0xff]  }
  0xd7   : > { %1862 = vmatprep.subr.bf16.mxu0 %v4187_v47  ;;  %2248 = vmatprep.subr.bf16.mxu1 %v4190_v48  ;;  %v4268_v47 = vld [vmem:[%s4779_s23 + $0xe8] ss:$16 sps:$4 sm:$0xff]   ;;  %v4269_v48 = vld [vmem:[%s4779_s23 + $0x10c] ss:$16 sps:$4 sm:$0xff]  }
  0xda   : > { %1863 = vmatpush1.bf16.msra.mxu0 %v4185_v49  ;;  %2249 = vmatpush1.bf16.msra.mxu1 %v4188_v50  ;;  %v4271_v49 = vld [vmem:[%s4779_s23 + $0x108] ss:$16 sps:$4 sm:$0xff]   ;;  %v4272_v50 = vld [vmem:[%s4779_s23 + $0x12c] ss:$16 sps:$4 sm:$0xff]  }
  0xdb   : > { %1864 = vmatprep.subr.bf16.mxu0 %v4196_v51  ;;  %2250 = vmatprep.subr.bf16.mxu1 %v4199_v52  ;;  %v4274_v51 = vld [vmem:[%s4779_s23 + $0x128] ss:$16 sps:$4 sm:$0xff]   ;;  %v4275_v52 = vld [vmem:[%s4779_s23 + $0x14c] ss:$16 sps:$4 sm:$0xff]  }
  0xdc   : > { %1734 = vmatmul.mubr.bf16.gmra.mrb[20].mxu0 %v4148_v53  ;;  %2120 = vmatmul.mubr.bf16.gmra.mrb[20].mxu1 %v4148_v53  ;;  %v4277_v53 = vld [vmem:[%s4779_s23 + $0x148] ss:$16 sps:$4 sm:$0xff]  }
  0xdd   : > { %1743 = vmatprep.mubr.bf16.mxu0 %v4155_v54  ;;  %2129 = vmatprep.mubr.bf16.mxu1 %v4155_v54  ;;  %v4278_v54 = vld [vmem:[%s4779_s23 + $0x16c] ss:$16 sps:$4 sm:$0xff]  }
  0xde   : > { %1865 = vmatpush1.bf16.msra.mxu0 %v4194_v55  ;;  %2251 = vmatpush1.bf16.msra.mxu1 %v4197_v56  ;;  %v4280_v55 = vld [vmem:[%s4779_s23 + $0x168] ss:$16 sps:$4 sm:$0xff]   ;;  %v4281_v56 = vld [vmem:[%s4779_s23 + $0x18c] ss:$16 sps:$4 sm:$0xff]  }
  0xdf   : > { %1866 = vmatprep.subr.bf16.mxu0 %v4205_v57  ;;  %2252 = vmatprep.subr.bf16.mxu1 %v4208_v58  ;;  %v4283_v57 = vld [vmem:[%s4779_s23 + $0x188] ss:$16 sps:$4 sm:$0xff]   ;;  %v4284_v58 = vld [vmem:[%s4779_s23 + $0x1ac] ss:$16 sps:$4 sm:$0xff]  }
  0xe2   : > { %1867 = vmatpush1.bf16.msra.mxu0 %v4203_v59  ;;  %2253 = vmatpush1.bf16.msra.mxu1 %v4206_v60  ;;  %v4286_v59 = vld [vmem:[%s4779_s23 + $0x1a8] ss:$16 sps:$4 sm:$0xff]   ;;  %v4287_v60 = vld [vmem:[%s4779_s23 + $0x1cc] ss:$16 sps:$4 sm:$0xff]  }
  0xe3   : > { %1868 = vmatprep.subr.bf16.mxu0 %v4214_v61  ;;  %2254 = vmatprep.subr.bf16.mxu1 %v4217_v62  ;;  %v4289_v61 = vld [vmem:[%s4779_s23 + $0x1c8] ss:$16 sps:$4 sm:$0xff]   ;;  %v4290_v62 = vld [vmem:[%s4779_s23 + $0x1ec] ss:$16 sps:$4 sm:$0xff]  }
  0xe4   : > { %1744 = vmatmul.mubr.bf16.gmra.mrb[24].mxu0 %v4157_v63  ;;  %2130 = vmatmul.mubr.bf16.gmra.mrb[24].mxu1 %v4157_v63  ;;  %v4292_v63 = vld [vmem:[%s4779_s23 + $0x1e8] ss:$16 sps:$4 sm:$0xff]   ;;  %s5055_s23 = scalar_lea.hbm %s5186_s8, %s3669_s19 }
  0xe5   : > { %1753 = vmatprep.mubr.bf16.mxu0 %v4164_v0  ;;  %2139 = vmatprep.mubr.bf16.mxu1 %v4164_v0 }
  0xe6   : > { %1869 = vmatpush1.bf16.msra.mxu0 %v4212_v1  ;;  %2255 = vmatpush1.bf16.msra.mxu1 %v4215_v2 }
  0xe7   : > { %1870 = vmatprep.subr.bf16.mxu0 %v4223_v3  ;;  %2256 = vmatprep.subr.bf16.mxu1 %v4226_v4 }
  0xea   : > { %1871 = vmatpush1.bf16.msra.mxu0 %v4221_v5  ;;  %2257 = vmatpush1.bf16.msra.mxu1 %v4224_v6 }
  0xeb   : > { %1872 = vmatprep.subr.bf16.mxu0 %v4232_v7  ;;  %2258 = vmatprep.subr.bf16.mxu1 %v4235_v9 }
  0xec   : > { %1754 = vmatmul.mubr.bf16.gmra.mrb[28].mxu0 %v4166_v8  ;;  %2140 = vmatmul.mubr.bf16.gmra.mrb[28].mxu1 %v4166_v8 }
  0xed   : > { %1763 = vmatprep.mubr.bf16.mxu0 %v4173_v10  ;;  %2149 = vmatprep.mubr.bf16.mxu1 %v4173_v10 }
  0xee   : > { %1873 = vmatpush1.bf16.msra.mxu0 %v4230_v11  ;;  %2259 = vmatpush1.bf16.msra.mxu1 %v4233_v12 }
  0xef   : > { %1874 = vmatprep.subr.bf16.mxu0 %v4241_v13  ;;  %2260 = vmatprep.subr.bf16.mxu1 %v4244_v14 }
  0xf2   : > { %1875 = vmatpush1.bf16.msra.mxu0 %v4239_v15  ;;  %2261 = vmatpush1.bf16.msra.mxu1 %v4242_v16 }
  0xf4   : > { %1764 = vmatmul.mubr.bf16.gmra.mrb[32].mxu0 %v4175_v17  ;;  %2150 = vmatmul.mubr.bf16.gmra.mrb[32].mxu1 %v4175_v17 }
  0xf5   : > { %1773 = vmatprep.mubr.bf16.mxu0 %v4182_v18  ;;  %2159 = vmatprep.mubr.bf16.mxu1 %v4182_v18 }
  0xfc   : > { %1774 = vmatmul.mubr.bf16.gmra.mrb[36].mxu0 %v4184_v19  ;;  %2160 = vmatmul.mubr.bf16.gmra.mrb[36].mxu1 %v4184_v19 }
  0xfd   : > { %1783 = vmatprep.mubr.bf16.mxu0 %v4191_v20  ;;  %2169 = vmatprep.mubr.bf16.mxu1 %v4191_v20 }
 0x104   : > { %1784 = vmatmul.mubr.bf16.gmra.mrb[40].mxu0 %v4193_v21  ;;  %2170 = vmatmul.mubr.bf16.gmra.mrb[40].mxu1 %v4193_v21 }
 0x105   : > { %1793 = vmatprep.mubr.bf16.mxu0 %v4200_v22  ;;  %2179 = vmatprep.mubr.bf16.mxu1 %v4200_v22 }
 0x10c   : > { %1794 = vmatmul.mubr.bf16.gmra.mrb[44].mxu0 %v4202_v23  ;;  %2180 = vmatmul.mubr.bf16.gmra.mrb[44].mxu1 %v4202_v23 }
 0x10d   : > { %1803 = vmatprep.mubr.bf16.mxu0 %v4209_v24  ;;  %2189 = vmatprep.mubr.bf16.mxu1 %v4209_v24 }
 0x114   : > { %1804 = vmatmul.mubr.bf16.gmra.mrb[48].mxu0 %v4211_v25  ;;  %2190 = vmatmul.mubr.bf16.gmra.mrb[48].mxu1 %v4211_v25 }
 0x115   : > { %1813 = vmatprep.mubr.bf16.mxu0 %v4218_v26  ;;  %2199 = vmatprep.mubr.bf16.mxu1 %v4218_v26 }
 0x11c   : > { %1814 = vmatmul.mubr.bf16.gmra.mrb[52].mxu0 %v4220_v27  ;;  %2200 = vmatmul.mubr.bf16.gmra.mrb[52].mxu1 %v4220_v27 }
 0x11d   : > { %1823 = vmatprep.mubr.bf16.mxu0 %v4227_v28  ;;  %2209 = vmatprep.mubr.bf16.mxu1 %v4227_v28 }
 0x124   : > { %1824 = vmatmul.mubr.bf16.gmra.mrb[56].mxu0 %v4229_v29  ;;  %2210 = vmatmul.mubr.bf16.gmra.mrb[56].mxu1 %v4229_v29 }
 0x125   : > { %1833 = vmatprep.mubr.bf16.mxu0 %v4236_v30  ;;  %2219 = vmatprep.mubr.bf16.mxu1 %v4236_v30 }
 0x12c   : > { %1834 = vmatmul.mubr.bf16.gmra.mrb[60].mxu0 %v4238_v31  ;;  %2220 = vmatmul.mubr.bf16.gmra.mrb[60].mxu1 %v4238_v31 }
 0x12d   : > { %1876 = vmatprep.mubr.bf16.mxu0 %v4247_v32  ;;  %2262 = vmatprep.mubr.bf16.mxu1 %v4247_v32 }
 0x134   : > { %1877 = vmatmul.mubr.bf16.vlgmr.msra.gmra.mrb[0].mxu0 %v4245_v33  ;;  %2263 = vmatmul.mubr.bf16.vlgmr.msra.gmra.mrb[0].mxu1 %v4245_v33 }
 0x135   : > { %1886 = vmatprep.mubr.bf16.mxu0 %v4248_v34  ;;  %2272 = vmatprep.mubr.bf16.mxu1 %v4248_v34 }
 0x13c   : > { %1887 = vmatmul.mubr.bf16.gmra.mrb[4].mxu0 %v4250_v35  ;;  %2273 = vmatmul.mubr.bf16.gmra.mrb[4].mxu1 %v4250_v35 }
 0x13d   : > { %1896 = vmatprep.mubr.bf16.mxu0 %v4251_v36  ;;  %2282 = vmatprep.mubr.bf16.mxu1 %v4251_v36 }
 0x144   : > { %1897 = vmatmul.mubr.bf16.gmra.mrb[8].mxu0 %v4253_v37  ;;  %2283 = vmatmul.mubr.bf16.gmra.mrb[8].mxu1 %v4253_v37 }
 0x145   : > { %1906 = vmatprep.mubr.bf16.mxu0 %v4254_v38  ;;  %2292 = vmatprep.mubr.bf16.mxu1 %v4254_v38 }
 0x14c   : > { %1907 = vmatmul.mubr.bf16.gmra.mrb[12].mxu0 %v4256_v39  ;;  %2293 = vmatmul.mubr.bf16.gmra.mrb[12].mxu1 %v4256_v39 }
 0x14d   : > { %1916 = vmatprep.mubr.bf16.mxu0 %v4257_v40  ;;  %2302 = vmatprep.mubr.bf16.mxu1 %v4257_v40 }
 0x154   : > { %1917 = vmatmul.mubr.bf16.gmra.mrb[16].mxu0 %v4259_v41  ;;  %2303 = vmatmul.mubr.bf16.gmra.mrb[16].mxu1 %v4259_v41 }
 0x155   : > { %1926 = vmatprep.mubr.bf16.mxu0 %v4260_v42  ;;  %2312 = vmatprep.mubr.bf16.mxu1 %v4260_v42 }
 0x15c   : > { %1927 = vmatmul.mubr.bf16.gmra.mrb[20].mxu0 %v4262_v43  ;;  %2313 = vmatmul.mubr.bf16.gmra.mrb[20].mxu1 %v4262_v43 }
 0x15d   : > { %1936 = vmatprep.mubr.bf16.mxu0 %v4263_v44  ;;  %2322 = vmatprep.mubr.bf16.mxu1 %v4263_v44 }
 0x164   : > { %1937 = vmatmul.mubr.bf16.gmra.mrb[24].mxu0 %v4265_v45  ;;  %2323 = vmatmul.mubr.bf16.gmra.mrb[24].mxu1 %v4265_v45 }
 0x165   : > { %1946 = vmatprep.mubr.bf16.mxu0 %v4266_v46  ;;  %2332 = vmatprep.mubr.bf16.mxu1 %v4266_v46 }
 0x16c   : > { %1947 = vmatmul.mubr.bf16.gmra.mrb[28].mxu0 %v4268_v47  ;;  %2333 = vmatmul.mubr.bf16.gmra.mrb[28].mxu1 %v4268_v47 }
 0x16d   : > { %1956 = vmatprep.mubr.bf16.mxu0 %v4269_v48  ;;  %2342 = vmatprep.mubr.bf16.mxu1 %v4269_v48 }
 0x174   : > { %1957 = vmatmul.mubr.bf16.gmra.mrb[32].mxu0 %v4271_v49  ;;  %2343 = vmatmul.mubr.bf16.gmra.mrb[32].mxu1 %v4271_v49 }
 0x175   : > { %1966 = vmatprep.mubr.bf16.mxu0 %v4272_v50  ;;  %2352 = vmatprep.mubr.bf16.mxu1 %v4272_v50 }
 0x17c   : > { %1967 = vmatmul.mubr.bf16.gmra.mrb[36].mxu0 %v4274_v51  ;;  %2353 = vmatmul.mubr.bf16.gmra.mrb[36].mxu1 %v4274_v51 }
 0x17d   : > { %1976 = vmatprep.mubr.bf16.mxu0 %v4275_v52  ;;  %2362 = vmatprep.mubr.bf16.mxu1 %v4275_v52 }
 0x184   : > { %1977 = vmatmul.mubr.bf16.gmra.mrb[40].mxu0 %v4277_v53  ;;  %2363 = vmatmul.mubr.bf16.gmra.mrb[40].mxu1 %v4277_v53 }
 0x185   : > { %1986 = vmatprep.mubr.bf16.mxu0 %v4278_v54  ;;  %2372 = vmatprep.mubr.bf16.mxu1 %v4278_v54 }
 0x18c   : > { %1987 = vmatmul.mubr.bf16.gmra.mrb[44].mxu0 %v4280_v55  ;;  %2373 = vmatmul.mubr.bf16.gmra.mrb[44].mxu1 %v4280_v55 }
 0x18d   : > { %1996 = vmatprep.mubr.bf16.mxu0 %v4281_v56  ;;  %2382 = vmatprep.mubr.bf16.mxu1 %v4281_v56 }
 0x194   : > { %1997 = vmatmul.mubr.bf16.gmra.mrb[48].mxu0 %v4283_v57  ;;  %2383 = vmatmul.mubr.bf16.gmra.mrb[48].mxu1 %v4283_v57 }
 0x195   : > { %2006 = vmatprep.mubr.bf16.mxu0 %v4284_v58  ;;  %2392 = vmatprep.mubr.bf16.mxu1 %v4284_v58 }
 0x19c   : > { %2007 = vmatmul.mubr.bf16.gmra.mrb[52].mxu0 %v4286_v59  ;;  %2393 = vmatmul.mubr.bf16.gmra.mrb[52].mxu1 %v4286_v59 }
 0x19d   : > { %2016 = vmatprep.mubr.bf16.mxu0 %v4287_v60  ;;  %2402 = vmatprep.mubr.bf16.mxu1 %v4287_v60 }
 0x1a4   : > { %2017 = vmatmul.mubr.bf16.gmra.mrb[56].mxu0 %v4289_v61  ;;  %2403 = vmatmul.mubr.bf16.gmra.mrb[56].mxu1 %v4289_v61 }
 0x1a5   : > { %2026 = vmatprep.mubr.bf16.mxu0 %v4290_v62  ;;  %2412 = vmatprep.mubr.bf16.mxu1 %v4290_v62 }
 0x1ac   : > { %2027 = vmatmul.mubr.bf16.gmra.mrb[60].mxu0 %v4292_v63  ;;  %2413 = vmatmul.mubr.bf16.gmra.mrb[60].mxu1 %v4292_v63 }
 0x207   : > { %v1878_v0 = vpop.f32.mrb[0].mxu0  ;;  %v2264_v1 = vpop.f32.mrb[0].mxu1 }
 0x208   : > { %v1880_v2 = vpop.f32.mrb[1].mxu0  ;;  %v2266_v3 = vpop.f32.mrb[1].mxu1 }
 0x209   : > { %v3675_v4 = vpack.c.bf16 %v1880_v2, %v1878_v0  ;;  %v3676_v5 = vpack.c.bf16 %v2266_v3, %v2264_v1  ;;  %v1882_v6 = vpop.f32.mrb[2].mxu0  ;;  %v2268_v7 = vpop.f32.mrb[2].mxu1 }
 0x20a   : > { %v1884_v8 = vpop.f32.mrb[3].mxu0  ;;  %v2270_v9 = vpop.f32.mrb[3].mxu1 }
 0x20b   : > { %3194 = vst [vmem:[%s4987_s12] sm:$0xff] %v3675_v4  ;;  %3195 = vst [vmem:[%s4987_s12 + $0x8] sm:$0xff] %v3676_v5  ;;  %v3677_v10 = vpack.c.bf16 %v1884_v8, %v1882_v6  ;;  %v3678_v11 = vpack.c.bf16 %v2270_v9, %v2268_v7 }
 0x20d   : > { %3196 = vst [vmem:[%s4987_s12 + $0x10] sm:$0xff] %v3677_v10  ;;  %3197 = vst [vmem:[%s4987_s12 + $0x18] sm:$0xff] %v3678_v11 }
 0x20f   : > { %v1888_v12 = vpop.f32.mrb[4].mxu0  ;;  %v2274_v13 = vpop.f32.mrb[4].mxu1 }
 0x210   : > { %v1890_v14 = vpop.f32.mrb[5].mxu0  ;;  %v2276_v15 = vpop.f32.mrb[5].mxu1 }
 0x211   : > { %v3679_v16 = vpack.c.bf16 %v1890_v14, %v1888_v12  ;;  %v3680_v17 = vpack.c.bf16 %v2276_v15, %v2274_v13  ;;  %v1892_v18 = vpop.f32.mrb[6].mxu0  ;;  %v2278_v19 = vpop.f32.mrb[6].mxu1 }
 0x212   : > { %v1894_v20 = vpop.f32.mrb[7].mxu0  ;;  %v2280_v21 = vpop.f32.mrb[7].mxu1 }
 0x213   : > { %3198 = vst [vmem:[%s4987_s12 + $0x20] sm:$0xff] %v3679_v16  ;;  %3199 = vst [vmem:[%s4987_s12 + $0x28] sm:$0xff] %v3680_v17  ;;  %v3681_v22 = vpack.c.bf16 %v1894_v20, %v1892_v18  ;;  %v3682_v23 = vpack.c.bf16 %v2280_v21, %v2278_v19 }
 0x215   : > { %3200 = vst [vmem:[%s4987_s12 + $0x30] sm:$0xff] %v3681_v22  ;;  %3201 = vst [vmem:[%s4987_s12 + $0x38] sm:$0xff] %v3682_v23 }
 0x217   : > { %v1898_v24 = vpop.f32.mrb[8].mxu0  ;;  %v2284_v25 = vpop.f32.mrb[8].mxu1 }
 0x218   : > { %v1900_v26 = vpop.f32.mrb[9].mxu0  ;;  %v2286_v27 = vpop.f32.mrb[9].mxu1 }
 0x219   : > { %v3683_v28 = vpack.c.bf16 %v1900_v26, %v1898_v24  ;;  %v3684_v29 = vpack.c.bf16 %v2286_v27, %v2284_v25  ;;  %v1902_v30 = vpop.f32.mrb[10].mxu0  ;;  %v2288_v31 = vpop.f32.mrb[10].mxu1 }
 0x21a   : > { %v1904_v32 = vpop.f32.mrb[11].mxu0  ;;  %v2290_v33 = vpop.f32.mrb[11].mxu1 }
 0x21b   : > { %3202 = vst [vmem:[%s4987_s12 + $0x40] sm:$0xff] %v3683_v28  ;;  %3203 = vst [vmem:[%s4987_s12 + $0x48] sm:$0xff] %v3684_v29  ;;  %v3685_v34 = vpack.c.bf16 %v1904_v32, %v1902_v30  ;;  %v3686_v35 = vpack.c.bf16 %v2290_v33, %v2288_v31 }
 0x21d   : > { %3204 = vst [vmem:[%s4987_s12 + $0x50] sm:$0xff] %v3685_v34  ;;  %3205 = vst [vmem:[%s4987_s12 + $0x58] sm:$0xff] %v3686_v35 }
 0x21f   : > { %v1908_v36 = vpop.f32.mrb[12].mxu0  ;;  %v2294_v37 = vpop.f32.mrb[12].mxu1 }
 0x220   : > { %v1910_v38 = vpop.f32.mrb[13].mxu0  ;;  %v2296_v39 = vpop.f32.mrb[13].mxu1 }
 0x221   : > { %v3687_v40 = vpack.c.bf16 %v1910_v38, %v1908_v36  ;;  %v3688_v41 = vpack.c.bf16 %v2296_v39, %v2294_v37  ;;  %v1912_v42 = vpop.f32.mrb[14].mxu0  ;;  %v2298_v43 = vpop.f32.mrb[14].mxu1 }
 0x222   : > { %v1914_v44 = vpop.f32.mrb[15].mxu0  ;;  %v2300_v45 = vpop.f32.mrb[15].mxu1 }
 0x223   : > { %3206 = vst [vmem:[%s4987_s12 + $0x60] sm:$0xff] %v3687_v40  ;;  %3207 = vst [vmem:[%s4987_s12 + $0x68] sm:$0xff] %v3688_v41  ;;  %v3689_v46 = vpack.c.bf16 %v1914_v44, %v1912_v42  ;;  %v3690_v47 = vpack.c.bf16 %v2300_v45, %v2298_v43 }
 0x225   : > { %3208 = vst [vmem:[%s4987_s12 + $0x70] sm:$0xff] %v3689_v46  ;;  %3209 = vst [vmem:[%s4987_s12 + $0x78] sm:$0xff] %v3690_v47 }
 0x227   : > { %v1918_v48 = vpop.f32.mrb[16].mxu0  ;;  %v2304_v49 = vpop.f32.mrb[16].mxu1 }
 0x228   : > { %v1920_v50 = vpop.f32.mrb[17].mxu0  ;;  %v2306_v51 = vpop.f32.mrb[17].mxu1 }
 0x229   : > { %v3691_v52 = vpack.c.bf16 %v1920_v50, %v1918_v48  ;;  %v3692_v53 = vpack.c.bf16 %v2306_v51, %v2304_v49  ;;  %v1922_v54 = vpop.f32.mrb[18].mxu0  ;;  %v2308_v55 = vpop.f32.mrb[18].mxu1 }
 0x22a   : > { %v1924_v56 = vpop.f32.mrb[19].mxu0  ;;  %v2310_v57 = vpop.f32.mrb[19].mxu1 }
 0x22b   : > { %3210 = vst [vmem:[%s4987_s12 + $0x80] sm:$0xff] %v3691_v52  ;;  %3211 = vst [vmem:[%s4987_s12 + $0x88] sm:$0xff] %v3692_v53  ;;  %v3693_v58 = vpack.c.bf16 %v1924_v56, %v1922_v54  ;;  %v3694_v59 = vpack.c.bf16 %v2310_v57, %v2308_v55 }
 0x22d   : > { %3212 = vst [vmem:[%s4987_s12 + $0x90] sm:$0xff] %v3693_v58  ;;  %3213 = vst [vmem:[%s4987_s12 + $0x98] sm:$0xff] %v3694_v59 }
 0x22f   : > { %v1928_v60 = vpop.f32.mrb[20].mxu0  ;;  %v2314_v61 = vpop.f32.mrb[20].mxu1 }
 0x230   : > { %v1930_v62 = vpop.f32.mrb[21].mxu0  ;;  %v2316_v63 = vpop.f32.mrb[21].mxu1 }
 0x231   : > { %v3695_v0 = vpack.c.bf16 %v1930_v62, %v1928_v60  ;;  %v3696_v1 = vpack.c.bf16 %v2316_v63, %v2314_v61  ;;  %v1932_v2 = vpop.f32.mrb[22].mxu0  ;;  %v2318_v3 = vpop.f32.mrb[22].mxu1 }
 0x232   : > { %v1934_v4 = vpop.f32.mrb[23].mxu0  ;;  %v2320_v5 = vpop.f32.mrb[23].mxu1 }
 0x233   : > { %3214 = vst [vmem:[%s4987_s12 + $0xa0] sm:$0xff] %v3695_v0  ;;  %3215 = vst [vmem:[%s4987_s12 + $0xa8] sm:$0xff] %v3696_v1  ;;  %v3697_v6 = vpack.c.bf16 %v1934_v4, %v1932_v2  ;;  %v3698_v7 = vpack.c.bf16 %v2320_v5, %v2318_v3 }
 0x235   : > { %3216 = vst [vmem:[%s4987_s12 + $0xb0] sm:$0xff] %v3697_v6  ;;  %3217 = vst [vmem:[%s4987_s12 + $0xb8] sm:$0xff] %v3698_v7 }
 0x237   : > { %v1938_v8 = vpop.f32.mrb[24].mxu0  ;;  %v2324_v9 = vpop.f32.mrb[24].mxu1 }
 0x238   : > { %v1940_v10 = vpop.f32.mrb[25].mxu0  ;;  %v2326_v11 = vpop.f32.mrb[25].mxu1 }
 0x239   : > { %v3699_v12 = vpack.c.bf16 %v1940_v10, %v1938_v8  ;;  %v3700_v13 = vpack.c.bf16 %v2326_v11, %v2324_v9  ;;  %v1942_v14 = vpop.f32.mrb[26].mxu0  ;;  %v2328_v15 = vpop.f32.mrb[26].mxu1 }
 0x23a   : > { %v1944_v16 = vpop.f32.mrb[27].mxu0  ;;  %v2330_v17 = vpop.f32.mrb[27].mxu1 }
 0x23b   : > { %3218 = vst [vmem:[%s4987_s12 + $0xc0] sm:$0xff] %v3699_v12  ;;  %3219 = vst [vmem:[%s4987_s12 + $0xc8] sm:$0xff] %v3700_v13  ;;  %v3701_v18 = vpack.c.bf16 %v1944_v16, %v1942_v14  ;;  %v3702_v19 = vpack.c.bf16 %v2330_v17, %v2328_v15 }
 0x23d   : > { %3220 = vst [vmem:[%s4987_s12 + $0xd0] sm:$0xff] %v3701_v18  ;;  %3221 = vst [vmem:[%s4987_s12 + $0xd8] sm:$0xff] %v3702_v19 }
 0x23f   : > { %v1948_v20 = vpop.f32.mrb[28].mxu0  ;;  %v2334_v21 = vpop.f32.mrb[28].mxu1 }
 0x240   : > { %v1950_v22 = vpop.f32.mrb[29].mxu0  ;;  %v2336_v23 = vpop.f32.mrb[29].mxu1 }
 0x241   : > { %v3703_v24 = vpack.c.bf16 %v1950_v22, %v1948_v20  ;;  %v3704_v25 = vpack.c.bf16 %v2336_v23, %v2334_v21  ;;  %v1952_v26 = vpop.f32.mrb[30].mxu0  ;;  %v2338_v27 = vpop.f32.mrb[30].mxu1 }
 0x242   : > { %v1954_v28 = vpop.f32.mrb[31].mxu0  ;;  %v2340_v29 = vpop.f32.mrb[31].mxu1 }
 0x243   : > { %3222 = vst [vmem:[%s4987_s12 + $0xe0] sm:$0xff] %v3703_v24  ;;  %3223 = vst [vmem:[%s4987_s12 + $0xe8] sm:$0xff] %v3704_v25  ;;  %v3705_v30 = vpack.c.bf16 %v1954_v28, %v1952_v26  ;;  %v3706_v31 = vpack.c.bf16 %v2340_v29, %v2338_v27 }
 0x245   : > { %3224 = vst [vmem:[%s4987_s12 + $0xf0] sm:$0xff] %v3705_v30  ;;  %3225 = vst [vmem:[%s4987_s12 + $0xf8] sm:$0xff] %v3706_v31 }
 0x247   : > { %v1958_v32 = vpop.f32.mrb[32].mxu0  ;;  %v2344_v33 = vpop.f32.mrb[32].mxu1 }
 0x248   : > { %v1960_v34 = vpop.f32.mrb[33].mxu0  ;;  %v2346_v35 = vpop.f32.mrb[33].mxu1 }
 0x249   : > { %v3707_v36 = vpack.c.bf16 %v1960_v34, %v1958_v32  ;;  %v3708_v37 = vpack.c.bf16 %v2346_v35, %v2344_v33  ;;  %v1962_v38 = vpop.f32.mrb[34].mxu0  ;;  %v2348_v39 = vpop.f32.mrb[34].mxu1 }
 0x24a   : > { %v1964_v40 = vpop.f32.mrb[35].mxu0  ;;  %v2350_v41 = vpop.f32.mrb[35].mxu1 }
 0x24b   : > { %3226 = vst [vmem:[%s4987_s12 + $0x100] sm:$0xff] %v3707_v36  ;;  %3227 = vst [vmem:[%s4987_s12 + $0x108] sm:$0xff] %v3708_v37  ;;  %v3709_v42 = vpack.c.bf16 %v1964_v40, %v1962_v38  ;;  %v3710_v43 = vpack.c.bf16 %v2350_v41, %v2348_v39 }
 0x24d   : > { %3228 = vst [vmem:[%s4987_s12 + $0x110] sm:$0xff] %v3709_v42  ;;  %3229 = vst [vmem:[%s4987_s12 + $0x118] sm:$0xff] %v3710_v43 }
 0x24f   : > { %v1968_v44 = vpop.f32.mrb[36].mxu0  ;;  %v2354_v45 = vpop.f32.mrb[36].mxu1 }
 0x250   : > { %v1970_v46 = vpop.f32.mrb[37].mxu0  ;;  %v2356_v47 = vpop.f32.mrb[37].mxu1 }
 0x251   : > { %v3711_v48 = vpack.c.bf16 %v1970_v46, %v1968_v44  ;;  %v3712_v49 = vpack.c.bf16 %v2356_v47, %v2354_v45  ;;  %v1972_v50 = vpop.f32.mrb[38].mxu0  ;;  %v2358_v51 = vpop.f32.mrb[38].mxu1 }
 0x252   : > { %v1974_v52 = vpop.f32.mrb[39].mxu0  ;;  %v2360_v53 = vpop.f32.mrb[39].mxu1 }
 0x253   : > { %3230 = vst [vmem:[%s4987_s12 + $0x120] sm:$0xff] %v3711_v48  ;;  %3231 = vst [vmem:[%s4987_s12 + $0x128] sm:$0xff] %v3712_v49  ;;  %v3713_v54 = vpack.c.bf16 %v1974_v52, %v1972_v50  ;;  %v3714_v55 = vpack.c.bf16 %v2360_v53, %v2358_v51 }
 0x255   : > { %3232 = vst [vmem:[%s4987_s12 + $0x130] sm:$0xff] %v3713_v54  ;;  %3233 = vst [vmem:[%s4987_s12 + $0x138] sm:$0xff] %v3714_v55 }
 0x257   : > { %v1978_v56 = vpop.f32.mrb[40].mxu0  ;;  %v2364_v57 = vpop.f32.mrb[40].mxu1 }
 0x258   : > { %v1980_v58 = vpop.f32.mrb[41].mxu0  ;;  %v2366_v59 = vpop.f32.mrb[41].mxu1 }
 0x259   : > { %v3715_v60 = vpack.c.bf16 %v1980_v58, %v1978_v56  ;;  %v3716_v61 = vpack.c.bf16 %v2366_v59, %v2364_v57  ;;  %v1982_v62 = vpop.f32.mrb[42].mxu0  ;;  %v2368_v63 = vpop.f32.mrb[42].mxu1 }
 0x25a   : > { %v1984_v0 = vpop.f32.mrb[43].mxu0  ;;  %v2370_v1 = vpop.f32.mrb[43].mxu1 }
 0x25b   : > { %3234 = vst [vmem:[%s4987_s12 + $0x140] sm:$0xff] %v3715_v60  ;;  %3235 = vst [vmem:[%s4987_s12 + $0x148] sm:$0xff] %v3716_v61  ;;  %v3717_v2 = vpack.c.bf16 %v1984_v0, %v1982_v62  ;;  %v3718_v3 = vpack.c.bf16 %v2370_v1, %v2368_v63 }
 0x25d   : > { %3236 = vst [vmem:[%s4987_s12 + $0x150] sm:$0xff] %v3717_v2  ;;  %3237 = vst [vmem:[%s4987_s12 + $0x158] sm:$0xff] %v3718_v3 }
 0x25f   : > { %v1988_v4 = vpop.f32.mrb[44].mxu0  ;;  %v2374_v5 = vpop.f32.mrb[44].mxu1 }
 0x260   : > { %v1990_v6 = vpop.f32.mrb[45].mxu0  ;;  %v2376_v7 = vpop.f32.mrb[45].mxu1 }
 0x261   : > { %v3719_v8 = vpack.c.bf16 %v1990_v6, %v1988_v4  ;;  %v3720_v9 = vpack.c.bf16 %v2376_v7, %v2374_v5  ;;  %v1992_v10 = vpop.f32.mrb[46].mxu0  ;;  %v2378_v11 = vpop.f32.mrb[46].mxu1 }
 0x262   : > { %v1994_v12 = vpop.f32.mrb[47].mxu0  ;;  %v2380_v13 = vpop.f32.mrb[47].mxu1 }
 0x263   : > { %3238 = vst [vmem:[%s4987_s12 + $0x160] sm:$0xff] %v3719_v8  ;;  %3239 = vst [vmem:[%s4987_s12 + $0x168] sm:$0xff] %v3720_v9  ;;  %v3721_v14 = vpack.c.bf16 %v1994_v12, %v1992_v10  ;;  %v3722_v15 = vpack.c.bf16 %v2380_v13, %v2378_v11 }
 0x265   : > { %3240 = vst [vmem:[%s4987_s12 + $0x170] sm:$0xff] %v3721_v14  ;;  %3241 = vst [vmem:[%s4987_s12 + $0x178] sm:$0xff] %v3722_v15 }
 0x267   : > { %v1998_v16 = vpop.f32.mrb[48].mxu0  ;;  %v2384_v17 = vpop.f32.mrb[48].mxu1 }
 0x268   : > { %v2000_v18 = vpop.f32.mrb[49].mxu0  ;;  %v2386_v19 = vpop.f32.mrb[49].mxu1 }
 0x269   : > { %v3723_v20 = vpack.c.bf16 %v2000_v18, %v1998_v16  ;;  %v3724_v21 = vpack.c.bf16 %v2386_v19, %v2384_v17  ;;  %v2002_v22 = vpop.f32.mrb[50].mxu0  ;;  %v2388_v23 = vpop.f32.mrb[50].mxu1 }
 0x26a   : > { %v2004_v24 = vpop.f32.mrb[51].mxu0  ;;  %v2390_v25 = vpop.f32.mrb[51].mxu1 }
 0x26b   : > { %3242 = vst [vmem:[%s4987_s12 + $0x180] sm:$0xff] %v3723_v20  ;;  %3243 = vst [vmem:[%s4987_s12 + $0x188] sm:$0xff] %v3724_v21  ;;  %v3725_v26 = vpack.c.bf16 %v2004_v24, %v2002_v22  ;;  %v3726_v27 = vpack.c.bf16 %v2390_v25, %v2388_v23 }
 0x26d   : > { %3244 = vst [vmem:[%s4987_s12 + $0x190] sm:$0xff] %v3725_v26  ;;  %3245 = vst [vmem:[%s4987_s12 + $0x198] sm:$0xff] %v3726_v27 }
 0x26f   : > { %v2008_v28 = vpop.f32.mrb[52].mxu0  ;;  %v2394_v29 = vpop.f32.mrb[52].mxu1 }
 0x270   : > { %v2010_v30 = vpop.f32.mrb[53].mxu0  ;;  %v2396_v31 = vpop.f32.mrb[53].mxu1 }
 0x271   : > { %v3727_v32 = vpack.c.bf16 %v2010_v30, %v2008_v28  ;;  %v3728_v33 = vpack.c.bf16 %v2396_v31, %v2394_v29  ;;  %v2012_v34 = vpop.f32.mrb[54].mxu0  ;;  %v2398_v35 = vpop.f32.mrb[54].mxu1 }
 0x272   : > { %v2014_v36 = vpop.f32.mrb[55].mxu0  ;;  %v2400_v37 = vpop.f32.mrb[55].mxu1 }
 0x273   : > { %3246 = vst [vmem:[%s4987_s12 + $0x1a0] sm:$0xff] %v3727_v32  ;;  %3247 = vst [vmem:[%s4987_s12 + $0x1a8] sm:$0xff] %v3728_v33  ;;  %v3729_v38 = vpack.c.bf16 %v2014_v36, %v2012_v34  ;;  %v3730_v39 = vpack.c.bf16 %v2400_v37, %v2398_v35 }
 0x275   : > { %3248 = vst [vmem:[%s4987_s12 + $0x1b0] sm:$0xff] %v3729_v38  ;;  %3249 = vst [vmem:[%s4987_s12 + $0x1b8] sm:$0xff] %v3730_v39 }
 0x277   : > { %v2018_v40 = vpop.f32.mrb[56].mxu0  ;;  %v2404_v41 = vpop.f32.mrb[56].mxu1 }
 0x278   : > { %v2020_v42 = vpop.f32.mrb[57].mxu0  ;;  %v2406_v43 = vpop.f32.mrb[57].mxu1 }
 0x279   : > { %v3731_v44 = vpack.c.bf16 %v2020_v42, %v2018_v40  ;;  %v3732_v45 = vpack.c.bf16 %v2406_v43, %v2404_v41  ;;  %v2022_v46 = vpop.f32.mrb[58].mxu0  ;;  %v2408_v47 = vpop.f32.mrb[58].mxu1 }
 0x27a   : > { %v2024_v48 = vpop.f32.mrb[59].mxu0  ;;  %v2410_v49 = vpop.f32.mrb[59].mxu1 }
 0x27b   : > { %3250 = vst [vmem:[%s4987_s12 + $0x1c0] sm:$0xff] %v3731_v44  ;;  %3251 = vst [vmem:[%s4987_s12 + $0x1c8] sm:$0xff] %v3732_v45  ;;  %v3733_v50 = vpack.c.bf16 %v2024_v48, %v2022_v46  ;;  %v3734_v51 = vpack.c.bf16 %v2410_v49, %v2408_v47 }
 0x27d   : > { %3252 = vst [vmem:[%s4987_s12 + $0x1d0] sm:$0xff] %v3733_v50  ;;  %3253 = vst [vmem:[%s4987_s12 + $0x1d8] sm:$0xff] %v3734_v51 }
 0x27f   : > { %v2028_v52 = vpop.f32.mrb[60].mxu0  ;;  %v2414_v53 = vpop.f32.mrb[60].mxu1 }
 0x280   : > { %v2030_v54 = vpop.f32.mrb[61].mxu0  ;;  %v2416_v55 = vpop.f32.mrb[61].mxu1 }
 0x281   : > { %v3735_v56 = vpack.c.bf16 %v2030_v54, %v2028_v52  ;;  %v3736_v57 = vpack.c.bf16 %v2416_v55, %v2414_v53  ;;  %v2032_v58 = vpop.f32.mrb[62].mxu0  ;;  %v2418_v59 = vpop.f32.mrb[62].mxu1 }
 0x282   : > { %v2034_v60 = vpop.f32.mrb[63].mxu0  ;;  %v2420_v61 = vpop.f32.mrb[63].mxu1 }
 0x283   : > { %3254 = vst [vmem:[%s4987_s12 + $0x1e0] sm:$0xff] %v3735_v56  ;;  %3255 = vst [vmem:[%s4987_s12 + $0x1e8] sm:$0xff] %v3736_v57  ;;  %v3737_v62 = vpack.c.bf16 %v2034_v60, %v2032_v58  ;;  %v3738_v63 = vpack.c.bf16 %v2420_v61, %v2418_v59 }
 0x285   : > { %3256 = vst [vmem:[%s4987_s12 + $0x1f0] sm:$0xff] %v3737_v62  ;;  %3257 = vst [vmem:[%s4987_s12 + $0x1f8] sm:$0xff] %v3738_v63 }
 0x286   : > { %4366 = shalt.err (!%p4363_p11)
}
 0x287   : > { %s4367_s28 = scalar_lea.hbm %s5055_s23, 8192  ;;  %s4371_s26 = scalar_lea.hbm %s5186_s8, 32768 }
 0x288   : > { %p4368_p2 = scmp.ne.s32.totalorder %s5055_s23, %s4367_s28  ;;  %p4372_p7 = scmp.lt.u32.totalorder %s5055_s23, %s5186_s8 }
 0x289   : > { %p4373_p13 = scmp.lt.u32.totalorder %s4371_s26, %s4367_s28  ;;  %p4375_p1 = scmp.lt.u32.totalorder %s4367_s28, %s5055_s23 }
 0x28a   : > { %p4369_p5 = pnand %p4368_p2, %p5187_p12 }
 0x28b   : > { %p4374_p6 = por %p4373_p13, %p4372_p7 }
 0x28c   : > { %p4370_p3 = pneg %p4369_p5 }
 0x28d   : > { %p4376_p9 = por %p4375_p1, %p4374_p6 }
 0x28f   : > { %p4377_p0 = pnand %p4376_p9, %p4370_p3 }
 0x291   : > { %4380 = shalt.err (!%p4377_p0)
}
 0x292   : > { %s4511_s19 = smov 256   ;;  %s4512_s4 = smov 512  }
 0x293   : > { %s4513_s15 = smov 16  }
 0x294   : > { %3872 = dma.vmem_to_hbm [thread:$0]  (%p5187_p12), %s5057_s18, 8192, %s5055_s23, %s5065_s5, %s4511_s19, %s4512_s4, %s4513_s15  }
 0x295 PF: > { %p3886_p4 = scmp.ge.s32.totalorder %s4503_s22, 2  ;;  %s3290_s25 = sand.u32 1, %s4451_s9  }
 0x296   : > { %p5188_p10 = scmp.ne.s32.totalorder %s5177_s27, 0  ;;  %s3291_s2 = scalar_lea.sflag [#allocation5], %s3290_s25 }
 0x298   : > { %p3882_p8 = pnand %p3886_p4, %p5188_p10 }
 0x29a   : > { %4446 = dma.done.wait (!%p3882_p8), %s3291_s2, 8192  }
 0x29b   : > { %4448 = vsyncadd (!%p3882_p8), %s3291_s2, 4294959104  ;;  %s21_s22 = sadd.s32 1, %s4503_s22   ;;  %s5190_s18 = sld [smem:[#allocation16_spill]] }
 0x29c   : > { %p5094_p11 = scmp.ge.s32.totalorder %s21_s22, 6   ;;  %s5191_s19 = sld [smem:[#allocation13_spill]] }
 0x29d   : > { %s5192_s27 = sld [smem:[#allocation14_spill]]  ;;  %s5193_s21 = sld [smem:[#allocation15_spill]] }
 0x29e   : > { %s5194_s9 = smov %s4455_s10  ;;  %s5195_s10 = smov %s4459_s11 }
 0x29f   : > { %s5196_s11 = smov %s4723_s30  ;;  %s5197_s12 = smov %s4467_s13 }
 0x2a0   : > { %s5198_s13 = smov %s4471_s14  ;;  %s5200_s15 = smov %s4479_s16 }
 0x2a1   : > { %s5199_s14 = smov %s5190_s18  ;;  %s5201_s16 = smov %s4483_s17 }
 0x2a2   : > { %s5202_s17 = smov %s4720_s0  ;;  %s5203_s18 = smov %s4495_s20 }
 0x2a3   : > { %s5204_s20 = smov %s5192_s27  ;;  %20 = sbr.rel (!%p5094_p11) target bundleno = 15 (0xf), region = 94 }
 0x2aa   :  { %3296 = vsyncpa [#allocation4], 1 }
 0x2ab   :  { %3298 = vsyncpa [#allocation4 + $0x1], 1 }
 0x2ac   :  { %3299 = vsyncpa [#allocation7], 1 }
 0x2ad   :  { %3301 = vsyncpa [#allocation7 + $0x1], 1 }
 0x2ae   :  { %3302 = vsyncpa [#allocation5], 1 }
 0x2af   :  { %3304 = vsyncpa [#allocation5 + $0x1], 1 }

</bundles_post_ra>
